<compile_context>
chip_gen: v5e
topology: v5e:2x2
jax: 0.10.0
libtpu: 0.0.40
codegen_flags: <defaults>
</compile_context>

<pallas_src>
import functools

import jax
import jax.numpy as jnp
from jax.experimental import pallas as pl
from jax.experimental.pallas import tpu as pltpu

# ----------------------------------------------------------------------------
# Synthetic BigGAN-flavoured G and D configuration
# ----------------------------------------------------------------------------
DIM_Z = 32
SHARED_DIM = 16
N_CLASSES = 10
CH = 8
BOTTOM = 4                       # G starts at 4x4
IMG_RES = 8                      # one nearest-neighbour x2 upsample
IMG_CH = 3
HW = IMG_RES * IMG_RES           # 64
HID = CH * HW                    # 512 (lane dense)
IMG_FLAT = IMG_CH * HW           # 192
HEAD_LANES = 128                 # lane-padded width of the pooled head
G_FP16 = False
D_FP16 = False

WEIGHT_DTYPE = jnp.bfloat16      # MXU operand dtype (accumulation stays f32)
MAX_BATCH_TILE = 256             # fills the 2x256^2 MXU on v6e/v7x (use 128 on v5e)


# ----------------------------------------------------------------------------
# Pallas kernels
# ----------------------------------------------------------------------------
def _gd_fused_kernel(z_ref, sh_ref, wz_ref, ws_ref, b1_ref, wgc_ref, bgc_ref,
                     wd_ref, bd_ref, pool_ref, ew_ref, bdl_ref, *out_refs,
                     emit_image):
    """Fused fake branch:  D(G(z, shared(gy)), gy)  in a single kernel.

       G: relu(z @ Wz_up + sh @ Ws_up + b1_up)   (x2 upsample folded into columns)
          tanh(.. @ T_gc + b_gc)                 (3x3 same conv as Toeplitz matmul)
       D: relu(img @ T_d1 + b_d1)                (3x3 same conv as Toeplitz matmul)
          pooled = .. @ POOL                     (global sum pool as ones-matmul)
          out = sum(pooled * ew, lanes) + b_dl   (linear head + projection head)
       The fake image only leaves VMEM when emit_image (return_G_z) is set."""
    wt = WEIGHT_DTYPE
    h = jnp.dot(z_ref[...].astype(wt), wz_ref[...],
                preferred_element_type=jnp.float32)
    h += jnp.dot(sh_ref[...].astype(wt), ws_ref[...],
                 preferred_element_type=jnp.float32)
    h = jnp.maximum(h + b1_ref[...], 0.0)                      # [bt, HID]
    g = jnp.dot(h.astype(wt), wgc_ref[...],
                preferred_element_type=jnp.float32)
    g = jnp.tanh(g + bgc_ref[...])                             # [bt, IMG_FLAT]
    hd = jnp.dot(g.astype(wt), wd_ref[...],
                 preferred_element_type=jnp.float32)
    hd = jnp.maximum(hd + bd_ref[...], 0.0)                    # [bt, HID]
    pooled = jnp.dot(hd.astype(wt), pool_ref[...],
                     preferred_element_type=jnp.float32)       # [bt, HEAD_LANES]
    d = jnp.sum(pooled * ew_ref[...], axis=-1, keepdims=True) + bdl_ref[0]
    out_refs[0][...] = d.astype(out_refs[0].dtype)
    if emit_image:
        out_refs[1][...] = g.astype(out_refs[1].dtype)


def _d_only_kernel(x_ref, wd_ref, bd_ref, pool_ref, ew_ref, bdl_ref, d_ref):
    """D on real data: Toeplitz conv + relu + pooled head (same packed weights)."""
    wt = WEIGHT_DTYPE
    hd = jnp.dot(x_ref[...].astype(wt), wd_ref[...],
                 preferred_element_type=jnp.float32)
    hd = jnp.maximum(hd + bd_ref[...], 0.0)
    pooled = jnp.dot(hd.astype(wt), pool_ref[...],
                     preferred_element_type=jnp.float32)
    d = jnp.sum(pooled * ew_ref[...], axis=-1, keepdims=True) + bdl_ref[0]
    d_ref[...] = d.astype(d_ref.dtype)


# ----------------------------------------------------------------------------
# pallas_call wrappers
# ----------------------------------------------------------------------------
def _batch_tiling(batch, target=MAX_BATCH_TILE):
    """Batch tile: as large as possible (fills the MXU M dim and amortizes the
    ~0.35us per-grid-step cost), padded so every grid step is full, and split so
    the parallel batch axis has >= 2 steps when possible (v7x megacore)."""
    bt = min(target, -(-batch // 8) * 8)
    while bt > 8 and -(-batch // bt) < 2 and -(-batch // (bt // 2)) >= 2:
        bt //= 2
    padded = -(-batch // bt) * bt
    return bt, padded


def _pad_rows(a, rows):
    return a if a.shape[0] == rows else jnp.pad(
        a, ((0, rows - a.shape[0]),) + ((0, 0),) * (a.ndim - 1))


def gd_fused(z, sh, ew, q, emit_image):
    """Fused G->D fake branch.  Returns d_fake[:B] (and the flat image if asked)."""
    B = z.shape[0]
    bt, bp = _batch_tiling(B)
    z, sh, ew = (_pad_rows(a, bp) for a in (z, sh, ew))
    row = lambda i: (i, 0)
    const = lambda i: (0, 0)
    # TODO(synk): on v7x, mark the constant-weight specs below with
    # pipeline_mode=pl.Buffered(1) when the Toeplitz matrices grow enough for
    # double-buffered weights to threaten the 64 MiB VMEM (here they are <1 MiB).
    # TODO(synk): at realistic resolutions the O(HW^2) Toeplitz conv will not fit
    # VMEM — switch to a 9-shift (pltpu.roll) formulation or pipeline over K.
    in_specs = [
        pl.BlockSpec((bt, DIM_Z), row),
        pl.BlockSpec((bt, SHARED_DIM), row),
        pl.BlockSpec((DIM_Z, HID), const),
        pl.BlockSpec((SHARED_DIM, HID), const),
        pl.BlockSpec((1, HID), const),
        pl.BlockSpec((HID, IMG_FLAT), const),
        pl.BlockSpec((1, IMG_FLAT), const),
        pl.BlockSpec((IMG_FLAT, HID), const),
        pl.BlockSpec((1, HID), const),
        pl.BlockSpec((HID, HEAD_LANES), const),
        pl.BlockSpec((bt, HEAD_LANES), row),
        pl.BlockSpec(memory_space=pltpu.MemorySpace.SMEM),     # scalar head bias
    ]
    d_shape = jax.ShapeDtypeStruct((bp, 1), jnp.float32)
    d_spec = pl.BlockSpec((bt, 1), row)
    if emit_image:
        out_shape = (d_shape, jax.ShapeDtypeStruct((bp, IMG_FLAT), jnp.float32))
        out_specs = (d_spec, pl.BlockSpec((bt, IMG_FLAT), row))
    else:
        out_shape, out_specs = d_shape, d_spec
    out = pl.pallas_call(
        functools.partial(_gd_fused_kernel, emit_image=emit_image),
        grid=(bp // bt,),
        in_specs=in_specs,
        out_specs=out_specs,
        out_shape=out_shape,
        compiler_params=pltpu.CompilerParams(dimension_semantics=("parallel",)),
    )(z, sh, q["W_z_up"], q["W_s_up"], q["b_g1_up"], q["T_gc"], q["b_gc_exp"],
      q["T_d1"], q["b_d1_exp"], q["POOL"], ew, q["b_dl"])
    if emit_image:
        return out[0][:B], out[1][:B]
    return out[:B]


def d_only(x_flat, ew, q):
    """D on real data (shares T_d1 / POOL / head with the fused kernel)."""
    B = x_flat.shape[0]
    bt, bp = _batch_tiling(B)
    x_flat, ew = _pad_rows(x_flat, bp), _pad_rows(ew, bp)
    row = lambda i: (i, 0)
    const = lambda i: (0, 0)
    out = pl.pallas_call(
        _d_only_kernel,
        grid=(bp // bt,),
        in_specs=[
            pl.BlockSpec((bt, IMG_FLAT), row),
            pl.BlockSpec((IMG_FLAT, HID), const),
            pl.BlockSpec((1, HID), const),
            pl.BlockSpec((HID, HEAD_LANES), const),
            pl.BlockSpec((bt, HEAD_LANES), row),
            pl.BlockSpec(memory_space=pltpu.MemorySpace.SMEM),
        ],
        out_specs=pl.BlockSpec((bt, 1), row),
        out_shape=jax.ShapeDtypeStruct((bp, 1), jnp.float32),
        compiler_params=pltpu.CompilerParams(dimension_semantics=("parallel",)),
    )(x_flat, q["T_d1"], q["b_d1_exp"], q["POOL"], ew, q["b_dl"])
    return out[:B]


# ----------------------------------------------------------------------------
# One-time host-side weight packing (folds upsample / conv / pool / head layouts)
# ----------------------------------------------------------------------------
def _conv3x3_toeplitz(w_oihw, bias, H, W):
    """Fold a 3x3 same-padding conv (OIHW weights, NCHW data) into a dense
    [Cin*H*W, Cout*H*W] matrix T so the conv becomes x.reshape(N,Cin*H*W) @ T + b."""
    Cout, Cin, KH, KW = w_oihw.shape
    ii = jnp.arange(H)
    jj = jnp.arange(W)
    di = ii[:, None] - ii[None, :] + 1               # [H_in, H_out]
    dj = jj[:, None] - jj[None, :] + 1               # [W_in, W_out]
    vi = (di >= 0) & (di < KH)
    vj = (dj >= 0) & (dj < KW)
    di_c = jnp.clip(di, 0, KH - 1)
    dj_c = jnp.clip(dj, 0, KW - 1)
    w_g = w_oihw[:, :, di_c[:, :, None, None], dj_c[None, None, :, :]]
    mask = (vi[:, :, None, None] & vj[None, None, :, :])[None, None]
    t6 = jnp.where(mask, w_g, 0.0)
    t6 = jnp.transpose(t6, (1, 2, 4, 0, 3, 5))       # [Cin, Hi, Wi, Cout, Ho, Wo]
    t = t6.reshape(Cin * H * W, Cout * H * W)
    b_exp = jnp.repeat(bias, H * W).reshape(1, Cout * H * W)
    return t, b_exp


def _upsample_expand_linear(w, bias, ch, low, up):
    """Fold `reshape(B, ch, low, low)` + nearest x(up/low) upsample into the
    linear: output column (c*up*up + i*up + j) = input column
    (c*low*low + (i//f)*low + (j//f))."""
    K = w.shape[0]
    f = up // low
    idx = jnp.arange(up) // f
    w4 = w.reshape(K, ch, low, low)
    w_up = w4[:, :, idx[:, None], idx[None, :]]
    b4 = bias.reshape(ch, low, low)
    b_up = b4[:, idx[:, None], idx[None, :]]
    return w_up.reshape(K, ch * up * up), b_up.reshape(1, ch * up * up)


def make_params(key):
    ks = jax.random.split(key, 10)
    s = 0.05
    return {
        "shared_W": s * jax.random.normal(ks[0], (N_CLASSES, SHARED_DIM), jnp.float32),
        "W_g1": s * jax.random.normal(ks[1], (DIM_Z + SHARED_DIM, CH * BOTTOM * BOTTOM), jnp.float32),
        "b_g1": s * jax.random.normal(ks[6], (CH * BOTTOM * BOTTOM,), jnp.float32),
        "W_gc": s * jax.random.normal(ks[2], (IMG_CH, CH, 3, 3), jnp.float32),
        "b_gc": s * jax.random.normal(ks[7], (IMG_CH,), jnp.float32),
        "W_d1": s * jax.random.normal(ks[3], (CH, IMG_CH, 3, 3), jnp.float32),
        "b_d1": s * jax.random.normal(ks[8], (CH,), jnp.float32),
        "W_dl": s * jax.random.normal(ks[4], (CH, 1), jnp.float32),
        "b_dl": s * jax.random.normal(ks[9], (1,), jnp.float32),
        "embed_D": s * jax.random.normal(ks[5], (N_CLASSES, CH), jnp.float32),
    }


def prepare_params(p):
    """One-time packing of the raw parameters into the fused-kernel layouts."""
    q = dict(p)
    wdt = WEIGHT_DTYPE
    # G first layer with the x2 nearest upsample folded into its columns, split
    # into z / shared(y) parts so no host-side concat is needed.
    w1_up, b1_up = _upsample_expand_linear(p["W_g1"], p["b_g1"], CH, BOTTOM, IMG_RES)
    q["W_z_up"] = w1_up[:DIM_Z].astype(wdt)
    q["W_s_up"] = w1_up[DIM_Z:].astype(wdt)
    q["b_g1_up"] = b1_up                                        # (1, HID) f32
    # G output conv and D input conv as Toeplitz matmuls (no padded channels).
    t_gc, b_gc = _conv3x3_toeplitz(p["W_gc"], p["b_gc"], IMG_RES, IMG_RES)
    q["T_gc"], q["b_gc_exp"] = t_gc.astype(wdt), b_gc           # (HID, IMG_FLAT)
    t_d1, b_d1 = _conv3x3_toeplitz(p["W_d1"], p["b_d1"], IMG_RES, IMG_RES)
    q["T_d1"], q["b_d1_exp"] = t_d1.astype(wdt), b_d1           # (IMG_FLAT, HID)
    # Global sum pool as a constant block-diagonal ones matrix (HID -> HEAD_LANES).
    pool = jnp.zeros((HID, HEAD_LANES), jnp.float32)
    pool = pool.at[jnp.arange(HID), jnp.arange(HID) // HW].set(1.0)
    q["POOL"] = pool.astype(wdt)
    # Linear head + projection embedding folded into a per-class, lane-padded row.
    head = p["embed_D"] + p["W_dl"][:, 0][None, :]              # (N_CLASSES, CH)
    q["head_tbl"] = jnp.pad(head, ((0, 0), (0, HEAD_LANES - CH)))
    return q


# ----------------------------------------------------------------------------
# G_D forward — mirrors the PyTorch wrapper semantics
# ----------------------------------------------------------------------------
def g_d_forward(params, z, gy, x=None, dy=None, train_G=False,
                return_G_z=False, split_D=False):
    """Mirrors BigGAN's G_D.forward.  torch.set_grad_enabled(train_G) is an
    autograd concern only (no-op for a forward pass).  split_D only changes
    *when* D is invoked upstream; this synthetic D has no cross-batch state, so
    the fake and real halves are always evaluated by the same fused kernels."""
    del train_G, split_D
    sh = jnp.take(params["shared_W"], gy, axis=0)              # G.shared(gy)
    ew_fake = jnp.take(params["head_tbl"], gy, axis=0)         # D head vec for gy
    # TODO(synk): fold the gathers above (and dy's below) into the kernels via
    # PrefetchScalarGridSpec scalar-prefetch of the class ids; kept host-side
    # for simplicity (3 tiny XLA ops per forward).
    need_img = return_G_z and x is None
    fused = gd_fused(z, sh, ew_fake, params, emit_image=need_img)
    if need_img:
        d_fake, g_flat = fused
        G_z = g_flat.reshape(z.shape[0], IMG_CH, IMG_RES, IMG_RES)
        # fp16 plumbing only affects the *returned* image; inside the fused
        # kernel D already consumes the fake image at bf16 matmul precision.
        if G_FP16 and not D_FP16:
            G_z = G_z.astype(jnp.float32)
        if D_FP16 and not G_FP16:
            G_z = G_z.astype(jnp.bfloat16)
    else:
        d_fake = fused
        G_z = None
    if x is not None:
        if dy is None:
            raise ValueError("dy must be provided with x (the upstream G_D would "
                             "fail inside D's class embedding otherwise).")
        ew_real = jnp.take(params["head_tbl"], dy, axis=0)
        x_flat = x.reshape(x.shape[0], IMG_FLAT).astype(jnp.float32)
        d_real = d_only(x_flat, ew_real, params)
        return (d_fake, d_real)
    if return_G_z:
        return (d_fake, G_z)
    return d_fake


g_d_forward_jit = jax.jit(
    g_d_forward, static_argnames=("train_G", "return_G_z", "split_D"))


# ----------------------------------------------------------------------------
# Pure-JAX reference (semantic validation of the fused kernels)
# ----------------------------------------------------------------------------
def _ref_conv3x3(x, w, b):
    y = jax.lax.conv_general_dilated(
        x, w, window_strides=(1, 1), padding=((1, 1), (1, 1)),
        dimension_numbers=("NCHW", "OIHW", "NCHW"),
        precision=jax.lax.Precision.HIGHEST)
    return y + b[None, :, None, None]


def _ref_G(params, z, shared_y):
    B = z.shape[0]
    zc = jnp.concatenate([z, shared_y], axis=1)
    h = jnp.maximum(jnp.dot(zc, params["W_g1"],
                            precision=jax.lax.Precision.HIGHEST) + params["b_g1"], 0.0)
    h = h.reshape(B, CH, BOTTOM, BOTTOM)
    h = jnp.repeat(jnp.repeat(h, 2, axis=2), 2, axis=3)
    return jnp.tanh(_ref_conv3x3(h, params["W_gc"], params["b_gc"]))


def _ref_D(params, x, y):
    h = jnp.maximum(_ref_conv3x3(x, params["W_d1"], params["b_d1"]), 0.0)
    pooled = jnp.sum(h, axis=(2, 3))
    lin = jnp.dot(pooled, params["W_dl"],
                  precision=jax.lax.Precision.HIGHEST) + params["b_dl"]
    e = jnp.take(params["embed_D"], y, axis=0)
    return lin + jnp.sum(pooled * e, axis=-1, keepdims=True)


def _ref_g_d(params, z, gy, x=None, dy=None):
    gz = _ref_G(params, z, jnp.take(params["shared_W"], gy, axis=0))
    if x is None:
        return _ref_D(params, gz, gy), gz
    d_in = jnp.concatenate([gz, x], axis=0)
    d_cls = jnp.concatenate([gy, dy], axis=0)
    d_out = _ref_D(params, d_in, d_cls)
    return d_out[:gz.shape[0]], d_out[gz.shape[0]:]


def _check_packing(p, key):
    """Tight (f32, HIGHEST) host-side validation of the folded-weight packing
    itself — independent of the bf16 kernel tolerance."""
    hp = jax.lax.Precision.HIGHEST
    kz, kh, kx = jax.random.split(key, 3)
    # 1. upsample-folded first linear
    zc = jax.random.normal(kz, (4, DIM_Z + SHARED_DIM), jnp.float32)
    w_up, b_up = _upsample_expand_linear(p["W_g1"], p["b_g1"], CH, BOTTOM, IMG_RES)
    got = jnp.dot(zc, w_up, precision=hp) + b_up
    ref = (jnp.dot(zc, p["W_g1"], precision=hp) + p["b_g1"]).reshape(4, CH, BOTTOM, BOTTOM)
    ref = jnp.repeat(jnp.repeat(ref, 2, axis=2), 2, axis=3).reshape(4, HID)
    assert jnp.allclose(got, ref, rtol=1e-4, atol=1e-5)
    # 2. G output conv as Toeplitz
    h = jax.random.normal(kh, (4, CH, IMG_RES, IMG_RES), jnp.float32)
    t, b = _conv3x3_toeplitz(p["W_gc"], p["b_gc"], IMG_RES, IMG_RES)
    got = jnp.dot(h.reshape(4, HID), t, precision=hp) + b
    ref = _ref_conv3x3(h, p["W_gc"], p["b_gc"]).reshape(4, IMG_FLAT)
    assert jnp.allclose(got, ref, rtol=1e-4, atol=1e-5)
    # 3. D input conv as Toeplitz
    x = jax.random.normal(kx, (4, IMG_CH, IMG_RES, IMG_RES), jnp.float32)
    t, b = _conv3x3_toeplitz(p["W_d1"], p["b_d1"], IMG_RES, IMG_RES)
    got = jnp.dot(x.reshape(4, IMG_FLAT), t, precision=hp) + b
    ref = _ref_conv3x3(x, p["W_d1"], p["b_d1"]).reshape(4, HID)
    assert jnp.allclose(got, ref, rtol=1e-4, atol=1e-5)


# ----------------------------------------------------------------------------
# Demo
# ----------------------------------------------------------------------------
if __name__ == "__main__":
    key = jax.random.PRNGKey(0)
    k_p, k_z, k_x, k_gy, k_dy, k_chk = jax.random.split(key, 6)

    params = prepare_params(make_params(k_p))
    _check_packing(params, k_chk)   # tight f32 check of the weight folding

    B_fake, B_real = 2, 2
    z = jax.random.normal(k_z, (B_fake, DIM_Z), jnp.float32)
    gy = jax.random.randint(k_gy, (B_fake,), 0, N_CLASSES, jnp.int32)
    x = jax.random.normal(k_x, (B_real, IMG_CH, IMG_RES, IMG_RES), jnp.float32)
    dy = jax.random.randint(k_dy, (B_real,), 0, N_CLASSES, jnp.int32)

    # Joint (non-split) path: (D_fake, D_real).
    d_fake, d_real = g_d_forward_jit(params, z, gy, x=x, dy=dy)
    d_fake = jax.block_until_ready(d_fake)
    d_real = jax.block_until_ready(d_real)

    # split_D path, returning G_z as well (image written to HBM only here).
    d_fake2, g_z = g_d_forward_jit(params, z, gy, return_G_z=True, split_D=True)
    d_fake2 = jax.block_until_ready(d_fake2)
    g_z = jax.block_until_ready(g_z)

    assert d_fake.shape == (B_fake, 1)
    assert d_real.shape == (B_real, 1)
    assert d_fake2.shape == (B_fake, 1)
    assert g_z.shape == (B_fake, IMG_CH, IMG_RES, IMG_RES)

    # Numerical check against the pure-JAX f32 reference (tolerance sized for the
    # bf16 MXU operands; the packing itself is checked at 1e-5 above).
    rf, rr = _ref_g_d(params, z, gy, x=x, dy=dy)
    rf2, rgz = _ref_g_d(params, z, gy)
    tol = dict(rtol=2e-2, atol=2e-2)
    assert jnp.allclose(d_fake, rf, **tol)
    assert jnp.allclose(d_real, rr, **tol)
    assert jnp.allclose(d_fake2, rf2, **tol)
    assert jnp.allclose(g_z, rgz, **tol)

    print("KERNEL_OK")
</pallas_src>

<mosaic_0001>
module attributes {stable_mosaic.version = 11 : i64} {
  func.func @_gd_fused_kernel(%arg0: i32, %arg1: memref<8x32xf32, #tpu.memory_space<vmem>>, %arg2: memref<8x16xf32, #tpu.memory_space<vmem>>, %arg3: memref<32x512xbf16, #tpu.memory_space<vmem>>, %arg4: memref<16x512xbf16, #tpu.memory_space<vmem>>, %arg5: memref<1x512xf32, #tpu.memory_space<vmem>>, %arg6: memref<512x192xbf16, #tpu.memory_space<vmem>>, %arg7: memref<1x192xf32, #tpu.memory_space<vmem>>, %arg8: memref<192x512xbf16, #tpu.memory_space<vmem>>, %arg9: memref<1x512xf32, #tpu.memory_space<vmem>>, %arg10: memref<512x128xbf16, #tpu.memory_space<vmem>>, %arg11: memref<8x128xf32, #tpu.memory_space<vmem>>, %arg12: memref<1xf32, #tpu.memory_space<smem>>, %arg13: memref<8x1xf32, #tpu.memory_space<vmem>>) attributes {dimension_semantics = [#tpu.dimension_semantics<parallel>], iteration_bounds = array<i64: 1>, scalar_prefetch = 0 : i64, scratch_operands = 0 : i64, tpu.core_type = #tpu.core_type<tc>, window_params = [{transform_indices = @transform_0, window_bounds = array<i64: 8, 32>}, {transform_indices = @transform_1, window_bounds = array<i64: 8, 16>}, {pipeline_mode = #tpu.pipeline_mode<synchronous>, transform_indices = @transform_2, window_bounds = array<i64: 32, 512>}, {pipeline_mode = #tpu.pipeline_mode<synchronous>, transform_indices = @transform_3, window_bounds = array<i64: 16, 512>}, {pipeline_mode = #tpu.pipeline_mode<synchronous>, transform_indices = @transform_4, window_bounds = array<i64: 1, 512>}, {pipeline_mode = #tpu.pipeline_mode<synchronous>, transform_indices = @transform_5, window_bounds = array<i64: 512, 192>}, {pipeline_mode = #tpu.pipeline_mode<synchronous>, transform_indices = @transform_6, window_bounds = array<i64: 1, 192>}, {pipeline_mode = #tpu.pipeline_mode<synchronous>, transform_indices = @transform_7, window_bounds = array<i64: 192, 512>}, {pipeline_mode = #tpu.pipeline_mode<synchronous>, transform_indices = @transform_8, window_bounds = array<i64: 1, 512>}, {pipeline_mode = #tpu.pipeline_mode<synchronous>, transform_indices = @transform_9, window_bounds = array<i64: 512, 128>}, {transform_indices = @transform_10, window_bounds = array<i64: 8, 128>}, {transform_indices = @transform_11, window_bounds = array<i64: 1>}, {transform_indices = @transform_12, window_bounds = array<i64: 8, 1>}]} {
    %c0 = arith.constant 0 : index
    %c0_0 = arith.constant 0 : index
    %0 = vector.load %arg1[%c0, %c0_0] : memref<8x32xf32, #tpu.memory_space<vmem>>, vector<8x32xf32>
    %1 = arith.truncf %0 : vector<8x32xf32> to vector<8x32xbf16>
    %c0_1 = arith.constant 0 : index
    %c0_2 = arith.constant 0 : index
    %2 = vector.load %arg3[%c0_1, %c0_2] : memref<32x512xbf16, #tpu.memory_space<vmem>>, vector<32x512xbf16>
    %cst = arith.constant dense<0.000000e+00> : vector<8x512xf32>
    %3 = tpu.matmul %1, %2, %cst {dimension_numbers = #tpu.dot_dimension_numbers<[1], [0], [0], [1], [0, 0, 1, 1], [], []>} : vector<8x32xbf16>, vector<32x512xbf16>, vector<8x512xf32> -> vector<8x512xf32>
    %c0_3 = arith.constant 0 : index
    %c0_4 = arith.constant 0 : index
    %4 = vector.load %arg2[%c0_3, %c0_4] : memref<8x16xf32, #tpu.memory_space<vmem>>, vector<8x16xf32>
    %5 = arith.truncf %4 : vector<8x16xf32> to vector<8x16xbf16>
    %c0_5 = arith.constant 0 : index
    %c0_6 = arith.constant 0 : index
    %6 = vector.load %arg4[%c0_5, %c0_6] : memref<16x512xbf16, #tpu.memory_space<vmem>>, vector<16x512xbf16>
    %cst_7 = arith.constant dense<0.000000e+00> : vector<8x512xf32>
    %7 = tpu.matmul %5, %6, %cst_7 {dimension_numbers = #tpu.dot_dimension_numbers<[1], [0], [0], [1], [0, 0, 1, 1], [], []>} : vector<8x16xbf16>, vector<16x512xbf16>, vector<8x512xf32> -> vector<8x512xf32>
    %8 = arith.addf %3, %7 : vector<8x512xf32>
    %c0_8 = arith.constant 0 : index
    %c0_9 = arith.constant 0 : index
    %9 = vector.load %arg5[%c0_8, %c0_9] : memref<1x512xf32, #tpu.memory_space<vmem>>, vector<1x512xf32>
    %10 = vector.broadcast %9 : vector<1x512xf32> to vector<8x512xf32>
    %11 = arith.addf %8, %10 : vector<8x512xf32>
    %cst_10 = arith.constant 0.000000e+00 : f32
    %12 = vector.broadcast %cst_10 : f32 to vector<8x512xf32>
    %13 = arith.maximumf %11, %12 : vector<8x512xf32>
    %14 = arith.truncf %13 : vector<8x512xf32> to vector<8x512xbf16>
    %c0_11 = arith.constant 0 : index
    %c0_12 = arith.constant 0 : index
    %15 = vector.load %arg6[%c0_11, %c0_12] : memref<512x192xbf16, #tpu.memory_space<vmem>>, vector<512x192xbf16>
    %cst_13 = arith.constant dense<0.000000e+00> : vector<8x192xf32>
    %16 = tpu.matmul %14, %15, %cst_13 {dimension_numbers = #tpu.dot_dimension_numbers<[1], [0], [0], [1], [0, 0, 1, 1], [], []>} : vector<8x512xbf16>, vector<512x192xbf16>, vector<8x192xf32> -> vector<8x192xf32>
    %c0_14 = arith.constant 0 : index
    %c0_15 = arith.constant 0 : index
    %17 = vector.load %arg7[%c0_14, %c0_15] : memref<1x192xf32, #tpu.memory_space<vmem>>, vector<1x192xf32>
    %18 = vector.broadcast %17 : vector<1x192xf32> to vector<8x192xf32>
    %19 = arith.addf %16, %18 : vector<8x192xf32>
    %20 = math.tanh %19 : vector<8x192xf32>
    %21 = arith.truncf %20 : vector<8x192xf32> to vector<8x192xbf16>
    %c0_16 = arith.constant 0 : index
    %c0_17 = arith.constant 0 : index
    %22 = vector.load %arg8[%c0_16, %c0_17] : memref<192x512xbf16, #tpu.memory_space<vmem>>, vector<192x512xbf16>
    %cst_18 = arith.constant dense<0.000000e+00> : vector<8x512xf32>
    %23 = tpu.matmul %21, %22, %cst_18 {dimension_numbers = #tpu.dot_dimension_numbers<[1], [0], [0], [1], [0, 0, 1, 1], [], []>} : vector<8x192xbf16>, vector<192x512xbf16>, vector<8x512xf32> -> vector<8x512xf32>
    %c0_19 = arith.constant 0 : index
    %c0_20 = arith.constant 0 : index
    %24 = vector.load %arg9[%c0_19, %c0_20] : memref<1x512xf32, #tpu.memory_space<vmem>>, vector<1x512xf32>
    %25 = vector.broadcast %24 : vector<1x512xf32> to vector<8x512xf32>
    %26 = arith.addf %23, %25 : vector<8x512xf32>
    %cst_21 = arith.constant 0.000000e+00 : f32
    %27 = vector.broadcast %cst_21 : f32 to vector<8x512xf32>
    %28 = arith.maximumf %26, %27 : vector<8x512xf32>
    %29 = arith.truncf %28 : vector<8x512xf32> to vector<8x512xbf16>
    %c0_22 = arith.constant 0 : index
    %c0_23 = arith.constant 0 : index
    %30 = vector.load %arg10[%c0_22, %c0_23] : memref<512x128xbf16, #tpu.memory_space<vmem>>, vector<512x128xbf16>
    %cst_24 = arith.constant dense<0.000000e+00> : vector<8x128xf32>
    %31 = tpu.matmul %29, %30, %cst_24 {dimension_numbers = #tpu.dot_dimension_numbers<[1], [0], [0], [1], [0, 0, 1, 1], [], []>} : vector<8x512xbf16>, vector<512x128xbf16>, vector<8x128xf32> -> vector<8x128xf32>
    %c0_25 = arith.constant 0 : index
    %c0_26 = arith.constant 0 : index
    %32 = vector.load %arg11[%c0_25, %c0_26] : memref<8x128xf32, #tpu.memory_space<vmem>>, vector<8x128xf32>
    %33 = arith.mulf %31, %32 : vector<8x128xf32>
    %cst_27 = arith.constant dense<0.000000e+00> : vector<8xf32>
    %34 = vector.multi_reduction <add>, %33, %cst_27 [1] : vector<8x128xf32> to vector<8xf32>
    %35 = vector.shape_cast %34 : vector<8xf32> to vector<8x1xf32>
    %c0_28 = arith.constant 0 : index
    %36 = memref.load %arg12[%c0_28] : memref<1xf32, #tpu.memory_space<smem>>
    %37 = vector.broadcast %36 : f32 to vector<8x1xf32>
    %38 = arith.addf %35, %37 : vector<8x1xf32>
    %c0_29 = arith.constant 0 : index
    %c0_30 = arith.constant 0 : index
    %39 = vector.load %arg13[%c0_29, %c0_30] : memref<8x1xf32, #tpu.memory_space<vmem>>, vector<8x1xf32>
    tpu.vector_store %arg13[%c0_29, %c0_30], %38 {strides = array<i32>} : memref<8x1xf32, #tpu.memory_space<vmem>>, vector<8x1xf32>,
    return
  }
  func.func @transform_0(%arg0: i32) -> (i32, i32) {
    %c0_i32 = arith.constant 0 : i32
    %c0_i32_0 = arith.constant 0 : i32
    return %arg0, %c0_i32 : i32, i32
  }
  func.func @transform_1(%arg0: i32) -> (i32, i32) {
    %c0_i32 = arith.constant 0 : i32
    %c0_i32_0 = arith.constant 0 : i32
    return %arg0, %c0_i32 : i32, i32
  }
  func.func @transform_2(%arg0: i32) -> (i32, i32) {
    %c0_i32 = arith.constant 0 : i32
    %c0_i32_0 = arith.constant 0 : i32
    %c0_i32_1 = arith.constant 0 : i32
    return %c0_i32, %c0_i32_0 : i32, i32
  }
  func.func @transform_3(%arg0: i32) -> (i32, i32) {
    %c0_i32 = arith.constant 0 : i32
    %c0_i32_0 = arith.constant 0 : i32
    %c0_i32_1 = arith.constant 0 : i32
    return %c0_i32, %c0_i32_0 : i32, i32
  }
  func.func @transform_4(%arg0: i32) -> (i32, i32) {
    %c0_i32 = arith.constant 0 : i32
    %c0_i32_0 = arith.constant 0 : i32
    %c0_i32_1 = arith.constant 0 : i32
    return %c0_i32, %c0_i32_0 : i32, i32
  }
  func.func @transform_5(%arg0: i32) -> (i32, i32) {
    %c0_i32 = arith.constant 0 : i32
    %c0_i32_0 = arith.constant 0 : i32
    %c0_i32_1 = arith.constant 0 : i32
    return %c0_i32, %c0_i32_0 : i32, i32
  }
  func.func @transform_6(%arg0: i32) -> (i32, i32) {
    %c0_i32 = arith.constant 0 : i32
    %c0_i32_0 = arith.constant 0 : i32
    %c0_i32_1 = arith.constant 0 : i32
    return %c0_i32, %c0_i32_0 : i32, i32
  }
  func.func @transform_7(%arg0: i32) -> (i32, i32) {
    %c0_i32 = arith.constant 0 : i32
    %c0_i32_0 = arith.constant 0 : i32
    %c0_i32_1 = arith.constant 0 : i32
    return %c0_i32, %c0_i32_0 : i32, i32
  }
  func.func @transform_8(%arg0: i32) -> (i32, i32) {
    %c0_i32 = arith.constant 0 : i32
    %c0_i32_0 = arith.constant 0 : i32
    %c0_i32_1 = arith.constant 0 : i32
    return %c0_i32, %c0_i32_0 : i32, i32
  }
  func.func @transform_9(%arg0: i32) -> (i32, i32) {
    %c0_i32 = arith.constant 0 : i32
    %c0_i32_0 = arith.constant 0 : i32
    %c0_i32_1 = arith.constant 0 : i32
    return %c0_i32, %c0_i32_0 : i32, i32
  }
  func.func @transform_10(%arg0: i32) -> (i32, i32) {
    %c0_i32 = arith.constant 0 : i32
    %c0_i32_0 = arith.constant 0 : i32
    return %arg0, %c0_i32 : i32, i32
  }
  func.func @transform_11(%arg0: i32) -> i32 {
    %c0_i32 = arith.constant 0 : i32
    %c0_i32_0 = arith.constant 0 : i32
    return %c0_i32 : i32
  }
  func.func @transform_12(%arg0: i32) -> (i32, i32) {
    %c0_i32 = arith.constant 0 : i32
    %c0_i32_0 = arith.constant 0 : i32
    return %arg0, %c0_i32 : i32, i32
  }
}

module attributes {stable_mosaic.version = 11 : i64} {
  func.func @_d_only_kernel(%arg0: i32, %arg1: memref<8x192xf32, #tpu.memory_space<vmem>>, %arg2: memref<192x512xbf16, #tpu.memory_space<vmem>>, %arg3: memref<1x512xf32, #tpu.memory_space<vmem>>, %arg4: memref<512x128xbf16, #tpu.memory_space<vmem>>, %arg5: memref<8x128xf32, #tpu.memory_space<vmem>>, %arg6: memref<1xf32, #tpu.memory_space<smem>>, %arg7: memref<8x1xf32, #tpu.memory_space<vmem>>) attributes {dimension_semantics = [#tpu.dimension_semantics<parallel>], iteration_bounds = array<i64: 1>, scalar_prefetch = 0 : i64, scratch_operands = 0 : i64, tpu.core_type = #tpu.core_type<tc>, window_params = [{transform_indices = @transform_0, window_bounds = array<i64: 8, 192>}, {pipeline_mode = #tpu.pipeline_mode<synchronous>, transform_indices = @transform_1, window_bounds = array<i64: 192, 512>}, {pipeline_mode = #tpu.pipeline_mode<synchronous>, transform_indices = @transform_2, window_bounds = array<i64: 1, 512>}, {pipeline_mode = #tpu.pipeline_mode<synchronous>, transform_indices = @transform_3, window_bounds = array<i64: 512, 128>}, {transform_indices = @transform_4, window_bounds = array<i64: 8, 128>}, {transform_indices = @transform_5, window_bounds = array<i64: 1>}, {transform_indices = @transform_6, window_bounds = array<i64: 8, 1>}]} {
    %c0 = arith.constant 0 : index
    %c0_0 = arith.constant 0 : index
    %0 = vector.load %arg1[%c0, %c0_0] : memref<8x192xf32, #tpu.memory_space<vmem>>, vector<8x192xf32>
    %1 = arith.truncf %0 : vector<8x192xf32> to vector<8x192xbf16>
    %c0_1 = arith.constant 0 : index
    %c0_2 = arith.constant 0 : index
    %2 = vector.load %arg2[%c0_1, %c0_2] : memref<192x512xbf16, #tpu.memory_space<vmem>>, vector<192x512xbf16>
    %cst = arith.constant dense<0.000000e+00> : vector<8x512xf32>
    %3 = tpu.matmul %1, %2, %cst {dimension_numbers = #tpu.dot_dimension_numbers<[1], [0], [0], [1], [0, 0, 1, 1], [], []>} : vector<8x192xbf16>, vector<192x512xbf16>, vector<8x512xf32> -> vector<8x512xf32>
    %c0_3 = arith.constant 0 : index
    %c0_4 = arith.constant 0 : index
    %4 = vector.load %arg3[%c0_3, %c0_4] : memref<1x512xf32, #tpu.memory_space<vmem>>, vector<1x512xf32>
    %5 = vector.broadcast %4 : vector<1x512xf32> to vector<8x512xf32>
    %6 = arith.addf %3, %5 : vector<8x512xf32>
    %cst_5 = arith.constant 0.000000e+00 : f32
    %7 = vector.broadcast %cst_5 : f32 to vector<8x512xf32>
    %8 = arith.maximumf %6, %7 : vector<8x512xf32>
    %9 = arith.truncf %8 : vector<8x512xf32> to vector<8x512xbf16>
    %c0_6 = arith.constant 0 : index
    %c0_7 = arith.constant 0 : index
    %10 = vector.load %arg4[%c0_6, %c0_7] : memref<512x128xbf16, #tpu.memory_space<vmem>>, vector<512x128xbf16>
    %cst_8 = arith.constant dense<0.000000e+00> : vector<8x128xf32>
    %11 = tpu.matmul %9, %10, %cst_8 {dimension_numbers = #tpu.dot_dimension_numbers<[1], [0], [0], [1], [0, 0, 1, 1], [], []>} : vector<8x512xbf16>, vector<512x128xbf16>, vector<8x128xf32> -> vector<8x128xf32>
    %c0_9 = arith.constant 0 : index
    %c0_10 = arith.constant 0 : index
    %12 = vector.load %arg5[%c0_9, %c0_10] : memref<8x128xf32, #tpu.memory_space<vmem>>, vector<8x128xf32>
    %13 = arith.mulf %11, %12 : vector<8x128xf32>
    %cst_11 = arith.constant dense<0.000000e+00> : vector<8xf32>
    %14 = vector.multi_reduction <add>, %13, %cst_11 [1] : vector<8x128xf32> to vector<8xf32>
    %15 = vector.shape_cast %14 : vector<8xf32> to vector<8x1xf32>
    %c0_12 = arith.constant 0 : index
    %16 = memref.load %arg6[%c0_12] : memref<1xf32, #tpu.memory_space<smem>>
    %17 = vector.broadcast %16 : f32 to vector<8x1xf32>
    %18 = arith.addf %15, %17 : vector<8x1xf32>
    %c0_13 = arith.constant 0 : index
    %c0_14 = arith.constant 0 : index
    %19 = vector.load %arg7[%c0_13, %c0_14] : memref<8x1xf32, #tpu.memory_space<vmem>>, vector<8x1xf32>
    tpu.vector_store %arg7[%c0_13, %c0_14], %18 {strides = array<i32>} : memref<8x1xf32, #tpu.memory_space<vmem>>, vector<8x1xf32>,
    return
  }
  func.func @transform_0(%arg0: i32) -> (i32, i32) {
    %c0_i32 = arith.constant 0 : i32
    %c0_i32_0 = arith.constant 0 : i32
    return %arg0, %c0_i32 : i32, i32
  }
  func.func @transform_1(%arg0: i32) -> (i32, i32) {
    %c0_i32 = arith.constant 0 : i32
    %c0_i32_0 = arith.constant 0 : i32
    %c0_i32_1 = arith.constant 0 : i32
    return %c0_i32, %c0_i32_0 : i32, i32
  }
  func.func @transform_2(%arg0: i32) -> (i32, i32) {
    %c0_i32 = arith.constant 0 : i32
    %c0_i32_0 = arith.constant 0 : i32
    %c0_i32_1 = arith.constant 0 : i32
    return %c0_i32, %c0_i32_0 : i32, i32
  }
  func.func @transform_3(%arg0: i32) -> (i32, i32) {
    %c0_i32 = arith.constant 0 : i32
    %c0_i32_0 = arith.constant 0 : i32
    %c0_i32_1 = arith.constant 0 : i32
    return %c0_i32, %c0_i32_0 : i32, i32
  }
  func.func @transform_4(%arg0: i32) -> (i32, i32) {
    %c0_i32 = arith.constant 0 : i32
    %c0_i32_0 = arith.constant 0 : i32
    return %arg0, %c0_i32 : i32, i32
  }
  func.func @transform_5(%arg0: i32) -> i32 {
    %c0_i32 = arith.constant 0 : i32
    %c0_i32_0 = arith.constant 0 : i32
    return %c0_i32 : i32
  }
  func.func @transform_6(%arg0: i32) -> (i32, i32) {
    %c0_i32 = arith.constant 0 : i32
    %c0_i32_0 = arith.constant 0 : i32
    return %arg0, %c0_i32 : i32, i32
  }
}

</mosaic_0001>

<bundles_post_ra>
// kernel: g_d_forward.3
= control target key start
LH: loop header
LB: loop body
LE: loop exit
PB: predicated region body
PF: predicated region fallthrough
CT: control target
= control target key end

     0   :  { %vm327_vm0 = vcmask 523264   ;;  %vm758_vm1 = vcmask 7168   ;;  %s1621_s1 = inlined_call_operand.vmem [shape: bf16[192,512], index: 1, kind: input, shape index: {}]   ;;  %s1622_s0 = inlined_call_operand.vmem [shape: f32[8,192], index: 0, kind: input, shape index: {}]   ;;  %s1623_s3 = inlined_call_operand.vmem [shape: bf16[512,128], index: 3, kind: input, shape index: {}]   ;;  %s1624_s2 = inlined_call_operand.vmem [shape: f32[1,512], index: 2, kind: input, shape index: {}]   ;;  %s1625_s4 = inlined_call_operand.vmem [shape: f32[8,128], index: 4, kind: input, shape index: {}]   ;;  %s1626_s5 = inlined_call_operand.<no memory space> [shape: f32[1], index: 5, kind: input, shape index: {}]   ;;  %s1627_s6 = inlined_call_operand.vmem [shape: f32[8,1], index: 6, kind: output, shape index: {}]  }
   0x1   :  { %v878_v0 = vld [vmem:[%s1621_s1 + $0xe0] sm:$0xf]  ;;  %v1118_v1 = vld [vmem:[%s1621_s1 + $0xec] sm:$0xf0]  ;;  %v1116_v5 = vld [vmem:[%s1621_s1 + $0xe4] sm:$0xf] }
   0x2   :  { %v942_v2 = vld [vmem:[%s1621_s1 + $0x160] sm:$0xf]  ;;  %v879_v3 = vor.u32 %v1118_v1, %v878_v0  ;;  %v1134_v4 = vld [vmem:[%s1621_s1 + $0x16c] sm:$0xf0]  ;;  %v880_v6 = vld [vmem:[%s1621_s1 + $0xf0] sm:$0xf0] }
   0x3   :  { %v943_v7 = vor.u32 %v1134_v4, %v942_v2  ;;  %v883_v8 = vor.u32 %v1116_v5, %v880_v6  ;;  %v862_v9 = vld [vmem:[%s1621_s1 + $0xc0] sm:$0xf]  ;;  %v1114_v10 = vld [vmem:[%s1621_s1 + $0xcc] sm:$0xf0]  ;;  %v1112_v14 = vld [vmem:[%s1621_s1 + $0xc4] sm:$0xf] }
   0x4   :  { %v926_v11 = vld [vmem:[%s1621_s1 + $0x140] sm:$0xf]  ;;  %331 = vmatpush.bf16.msra.mxu0 %v879_v3  ;;  %v863_v12 = vor.u32 %v1114_v10, %v862_v9  ;;  %v1130_v13 = vld [vmem:[%s1621_s1 + $0x14c] sm:$0xf0]  ;;  %v864_v15 = vld [vmem:[%s1621_s1 + $0xd0] sm:$0xf0] }
   0x5   :  { %348 = vmatpush.bf16.msra.mxu1 %v943_v7  ;;  %357 = vmatpush.bf16.msra.mxu2 %v883_v8  ;;  %v927_v16 = vor.u32 %v1130_v13, %v926_v11  ;;  %v867_v17 = vor.u32 %v1112_v14, %v864_v15  ;;  %v846_v18 = vld [vmem:[%s1621_s1 + $0xa0] sm:$0xf]  ;;  %v1110_v19 = vld [vmem:[%s1621_s1 + $0xac] sm:$0xf0]  ;;  %v1108_v22 = vld [vmem:[%s1621_s1 + $0xa4] sm:$0xf] }
   0x6   :  { %v910_v20 = vld [vmem:[%s1621_s1 + $0x120] sm:$0xf]  ;;  %v1126_v21 = vld [vmem:[%s1621_s1 + $0x12c] sm:$0xf0]  ;;  %v848_v23 = vld [vmem:[%s1621_s1 + $0xb0] sm:$0xf0]  ;;  %v847_v26 = vor.u32 %v1110_v19, %v846_v18 }
   0x7   :  { %v1132_v24 = vld [vmem:[%s1621_s1 + $0x164] sm:$0xf]  ;;  %v944_v25 = vld [vmem:[%s1621_s1 + $0x170] sm:$0xf0]  ;;  %v830_v28 = vld [vmem:[%s1621_s1 + $0x80] sm:$0xf]  ;;  %v911_v30 = vor.u32 %v1126_v21, %v910_v20  ;;  %v851_v31 = vor.u32 %v1108_v22, %v848_v23 }
   0x8   :  { %332 = vmatpush.bf16.msra.mxu0 %v863_v12  ;;  %v947_v27 = vor.u32 %v1132_v24, %v944_v25  ;;  %v1106_v29 = vld [vmem:[%s1621_s1 + $0x8c] sm:$0xf0]  ;;  %v894_v32 = vld [vmem:[%s1621_s1 + $0x100] sm:$0xf]  ;;  %v1128_v34 = vld [vmem:[%s1621_s1 + $0x144] sm:$0xf] }
   0x9   :  { %349 = vmatpush.bf16.msra.mxu1 %v927_v16  ;;  %358 = vmatpush.bf16.msra.mxu2 %v867_v17  ;;  %v1122_v33 = vld [vmem:[%s1621_s1 + $0x10c] sm:$0xf0]  ;;  %v1104_v35 = vld [vmem:[%s1621_s1 + $0x84] sm:$0xf]  ;;  %v832_v36 = vld [vmem:[%s1621_s1 + $0x90] sm:$0xf0]  ;;  %v831_v41 = vor.u32 %v1106_v29, %v830_v28 }
   0xa   :  { %374 = vmatpush.bf16.msra.mxu3 %v947_v27  ;;  %v928_v37 = vld [vmem:[%s1621_s1 + $0x150] sm:$0xf0]  ;;  %v886_v39 = vld [vmem:[%s1621_s1 + $0xe8] sm:$0xf]  ;;  %v1119_v40 = vld [vmem:[%s1621_s1 + $0xf4] sm:$0xf0]  ;;  %v895_v44 = vor.u32 %v1122_v33, %v894_v32  ;;  %v835_v45 = vor.u32 %v1104_v35, %v832_v36 }
   0xb   :  { %v931_v38 = vor.u32 %v1128_v34, %v928_v37  ;;  %v1124_v42 = vld [vmem:[%s1621_s1 + $0x124] sm:$0xf]  ;;  %v912_v43 = vld [vmem:[%s1621_s1 + $0x130] sm:$0xf0]  ;;  %v814_v46 = vld [vmem:[%s1621_s1 + $0x60] sm:$0xf]  ;;  %v887_v48 = vor.u32 %v1119_v40, %v886_v39 }
   0xc   :  { %333 = vmatpush.bf16.msra.mxu0 %v847_v26  ;;  %v1102_v47 = vld [vmem:[%s1621_s1 + $0x6c] sm:$0xf0]  ;;  %v1100_v49 = vld [vmem:[%s1621_s1 + $0x64] sm:$0xf]  ;;  %v816_v50 = vld [vmem:[%s1621_s1 + $0x70] sm:$0xf0]  ;;  %v915_v51 = vor.u32 %v1124_v42, %v912_v43 }
   0xd   :  { %350 = vmatpush.bf16.msra.mxu1 %v911_v30  ;;  %359 = vmatpush.bf16.msra.mxu2 %v851_v31  ;;  %v870_v52 = vld [vmem:[%s1621_s1 + $0xc8] sm:$0xf]  ;;  %v1115_v53 = vld [vmem:[%s1621_s1 + $0xd4] sm:$0xf0]  ;;  %v1120_v54 = vld [vmem:[%s1621_s1 + $0x104] sm:$0xf]  ;;  %v815_v56 = vor.u32 %v1102_v47, %v814_v46  ;;  %v819_v57 = vor.u32 %v1100_v49, %v816_v50 }
   0xe   :  { %375 = vmatpush.bf16.msra.mxu3 %v931_v38  ;;  %v896_v55 = vld [vmem:[%s1621_s1 + $0x110] sm:$0xf0]  ;;  %v798_v58 = vld [vmem:[%s1621_s1 + $0x40] sm:$0xf]  ;;  %v1098_v59 = vld [vmem:[%s1621_s1 + $0x4c] sm:$0xf0]  ;;  %v871_v61 = vor.u32 %v1115_v53, %v870_v52 }
   0xf   :  { %v26_v60 = vld [vmem:[%s1622_s0 + $0x8] sm:$0xff]  ;;  %v1096_v62 = vld [vmem:[%s1621_s1 + $0x44] sm:$0xf]  ;;  %v800_v63 = vld [vmem:[%s1621_s1 + $0x50] sm:$0xf0]  ;;  %v899_v0 = vor.u32 %v1120_v54, %v896_v55  ;;  %v799_v6 = vor.u32 %v1098_v59, %v798_v58 }
  0x10   :  { %334 = vmatpush.bf16.msra.mxu0 %v831_v41  ;;  %v1338_v1 = vpack.c.bf16 %v26_v60, %v26_v60  ;;  %v950_v2 = vld [vmem:[%s1621_s1 + $0x168] sm:$0xf]  ;;  %v1111_v4 = vld [vmem:[%s1621_s1 + $0xb4] sm:$0xf0]  ;;  %v782_v7 = vld [vmem:[%s1621_s1 + $0x20] sm:$0xf]  ;;  %v803_v9 = vor.u32 %v1096_v62, %v800_v63 }
  0x11   :  { %351 = vmatpush.bf16.msra.mxu1 %v895_v44  ;;  %360 = vmatpush.bf16.msra.mxu2 %v835_v45  ;;  %v854_v3 = vld [vmem:[%s1621_s1 + $0xa8] sm:$0xf]  ;;  %v1135_v5 = vld [vmem:[%s1621_s1 + $0x174] sm:$0xf0]  ;;  %v1094_v10 = vld [vmem:[%s1621_s1 + $0x2c] sm:$0xf0] }
  0x12   :  { %376 = vmatpush.bf16.msra.mxu3 %v915_v51  ;;  %v951_v8 = vor.u32 %v1135_v5, %v950_v2  ;;  %v934_v11 = vld [vmem:[%s1621_s1 + $0x148] sm:$0xf]  ;;  %v1131_v12 = vld [vmem:[%s1621_s1 + $0x154] sm:$0xf0]  ;;  %v855_v13 = vor.u32 %v1111_v4, %v854_v3  ;;  %v1092_v14 = vld [vmem:[%s1621_s1 + $0x24] sm:$0xf]  ;;  %v783_v19 = vor.u32 %v1094_v10, %v782_v7 }
  0x13   :  { %v784_v15 = vld [vmem:[%s1621_s1 + $0x30] sm:$0xf0]  ;;  %v838_v16 = vld [vmem:[%s1621_s1 + $0x88] sm:$0xf]  ;;  %v1107_v17 = vld [vmem:[%s1621_s1 + $0x94] sm:$0xf0]  ;;  %v935_v18 = vor.u32 %v1131_v12, %v934_v11 }
  0x14   :  { %335 = vmatpush.bf16.msra.mxu0 %v815_v56  ;;  %956 = vmatmul.msk.bf16.vlgmr.msra.gmra.mxu1 %vm327_vm0, %v1338_v1  ;;  %v766_v20 = vld [vmem:[%s1621_s1] sm:$0xf]  ;;  %v918_v21 = vld [vmem:[%s1621_s1 + $0x128] sm:$0xf]  ;;  %v1127_v22 = vld [vmem:[%s1621_s1 + $0x134] sm:$0xf0]  ;;  %v787_v23 = vor.u32 %v1092_v14, %v784_v15  ;;  %v839_v27 = vor.u32 %v1107_v17, %v838_v16 }
  0x15   :  { %383 = vmatpush.bf16.msrb.mxu1 %v887_v48  ;;  %361 = vmatpush.bf16.msra.mxu2 %v819_v57  ;;  %v1090_v24 = vld [vmem:[%s1621_s1 + $0xc] sm:$0xf0]  ;;  %v1088_v25 = vld [vmem:[%s1621_s1 + $0x4] sm:$0xf]  ;;  %v768_v26 = vld [vmem:[%s1621_s1 + $0x10] sm:$0xf0]  ;;  %v919_v32 = vor.u32 %v1127_v22, %v918_v21 }
  0x16   :  { %377 = vmatpush.bf16.msra.mxu3 %v899_v0  ;;  %v822_v28 = vld [vmem:[%s1621_s1 + $0x68] sm:$0xf]  ;;  %v1117_v29 = vld [vmem:[%s1621_s1 + $0xec] sm:$0xf]  ;;  %v888_v30 = vld [vmem:[%s1621_s1 + $0xf8] sm:$0xf0]  ;;  %v767_v35 = vor.u32 %v1090_v24, %v766_v20  ;;  %v771_v39 = vor.u32 %v1088_v25, %v768_v26 }
  0x17   :  { %v1103_v31 = vld [vmem:[%s1621_s1 + $0x74] sm:$0xf0]  ;;  %v1133_v33 = vld [vmem:[%s1621_s1 + $0x16c] sm:$0xf]  ;;  %v952_v34 = vld [vmem:[%s1621_s1 + $0x178] sm:$0xf0]  ;;  %v891_v40 = vor.u32 %v1117_v29, %v888_v30 }
  0x18   :  { %336 = vmatpush.bf16.msra.mxu0 %v799_v6  ;;  %v25_v36 = vld [vmem:[%s1622_s0] sm:$0xff]  ;;  %v902_v37 = vld [vmem:[%s1621_s1 + $0x108] sm:$0xf]  ;;  %v1123_v38 = vld [vmem:[%s1621_s1 + $0x114] sm:$0xf0]  ;;  %v823_v41 = vor.u32 %v1103_v31, %v822_v28  ;;  %v955_v45 = vor.u32 %v1133_v33, %v952_v34 }
  0x19   :  { %384 = vmatpush.bf16.msrb.mxu1 %v871_v61  ;;  %362 = vmatpush.bf16.msra.mxu2 %v803_v9  ;;  %v806_v42 = vld [vmem:[%s1621_s1 + $0x48] sm:$0xf]  ;;  %v1113_v43 = vld [vmem:[%s1621_s1 + $0xcc] sm:$0xf]  ;;  %v872_v44 = vld [vmem:[%s1621_s1 + $0xd8] sm:$0xf0]  ;;  %v1434_v46 = vpack.c.bf16 %v25_v36, %v25_v36  ;;  %v903_v48 = vor.u32 %v1123_v38, %v902_v37 }
  0x1a   :  { %400 = vmatpush.bf16.msrb.mxu3 %v951_v8  ;;  %v1099_v47 = vld [vmem:[%s1621_s1 + $0x54] sm:$0xf0]  ;;  %v1129_v49 = vld [vmem:[%s1621_s1 + $0x14c] sm:$0xf]  ;;  %v936_v50 = vld [vmem:[%s1621_s1 + $0x158] sm:$0xf0]  ;;  %v875_v51 = vor.u32 %v1113_v43, %v872_v44 }
  0x1b   :  { %957 = vmatmul.msk.bf16.vlgmr.msra.gmra.mxu3 %vm327_vm0, %v1338_v1  ;;  %v1143_v52 = vld [vmem:[%s1623_s3 + $0x38] sm:$0xff]  ;;  %v807_v53 = vor.u32 %v1099_v47, %v806_v42  ;;  %v790_v54 = vld [vmem:[%s1621_s1 + $0x28] sm:$0xf]  ;;  %v1109_v55 = vld [vmem:[%s1621_s1 + $0xac] sm:$0xf]  ;;  %v939_v57 = vor.u32 %v1129_v49, %v936_v50 }
  0x1c   :  { %337 = vmatpush.bf16.msra.mxu0 %v783_v19  ;;  %v856_v56 = vld [vmem:[%s1621_s1 + $0xb8] sm:$0xf0]  ;;  %v1095_v58 = vld [vmem:[%s1621_s1 + $0x34] sm:$0xf0]  ;;  %v1125_v59 = vld [vmem:[%s1621_s1 + $0x12c] sm:$0xf] }
  0x1d   :  { %385 = vmatpush.bf16.msrb.mxu1 %v855_v13  ;;  %363 = vmatpush.bf16.msra.mxu2 %v787_v23  ;;  %v920_v60 = vld [vmem:[%s1621_s1 + $0x138] sm:$0xf0]  ;;  %v1142_v61 = vld [vmem:[%s1623_s3 + $0x30] sm:$0xff]  ;;  %v859_v62 = vor.u32 %v1109_v55, %v856_v56  ;;  %v791_v63 = vor.u32 %v1095_v58, %v790_v54  ;;  %v774_v0 = vld [vmem:[%s1621_s1 + $0x8] sm:$0xf] }
  0x1e   :  { %401 = vmatpush.bf16.msrb.mxu3 %v935_v18  ;;  %v1105_v2 = vld [vmem:[%s1621_s1 + $0x8c] sm:$0xf]  ;;  %v840_v3 = vld [vmem:[%s1621_s1 + $0x98] sm:$0xf0]  ;;  %v923_v4 = vor.u32 %v1125_v59, %v920_v60  ;;  %v1091_v5 = vld [vmem:[%s1621_s1 + $0x14] sm:$0xf0] }
  0x1f   :  { %v1121_v6 = vld [vmem:[%s1621_s1 + $0x10c] sm:$0xf]  ;;  %v904_v7 = vld [vmem:[%s1621_s1 + $0x118] sm:$0xf0]  ;;  %v843_v9 = vor.u32 %v1105_v2, %v840_v3  ;;  %v775_v10 = vor.u32 %v1091_v5, %v774_v0  ;;  %v1140_v16 = vld [vmem:[%s1623_s3 + $0x20] sm:$0xff] }
  0x20   :  { %338 = vmatpush.bf16.msra.mxu0 %v767_v35  ;;  %v1141_v8 = vld [vmem:[%s1623_s3 + $0x28] sm:$0xff]  ;;  %v824_v12 = vld [vmem:[%s1621_s1 + $0x78] sm:$0xf0]  ;;  %v907_v13 = vor.u32 %v1121_v6, %v904_v7  ;;  %v1150_v20 = vld [vmem:[%s1623_s3 + $0x70] sm:$0xff] }
  0x21   :  { %386 = vmatpush.bf16.msrb.mxu1 %v839_v27  ;;  %364 = vmatpush.bf16.msra.mxu2 %v771_v39  ;;  %v1101_v11 = vld [vmem:[%s1621_s1 + $0x6c] sm:$0xf]  ;;  %v1151_v14 = vld [vmem:[%s1623_s3 + $0x78] sm:$0xff]  ;;  %v1158_v21 = vld [vmem:[%s1623_s3 + $0xb0] sm:$0xff] }
  0x22   :  { %402 = vmatpush.bf16.msrb.mxu3 %v919_v32  ;;  %v1159_v15 = vld [vmem:[%s1623_s3 + $0xb8] sm:$0xff]  ;;  %v827_v17 = vor.u32 %v1101_v11, %v824_v12  ;;  %v1097_v18 = vld [vmem:[%s1621_s1 + $0x4c] sm:$0xf]  ;;  %v1148_v30 = vld [vmem:[%s1623_s3 + $0x60] sm:$0xff] }
  0x23   :  { %339 = vmatmul.bf16.vlgmr.msra.gmra.mxu0 %v1434_v46  ;;  %v808_v19 = vld [vmem:[%s1621_s1 + $0x58] sm:$0xf0]  ;;  %v1093_v24 = vld [vmem:[%s1621_s1 + $0x2c] sm:$0xf]  ;;  %v1156_v35 = vld [vmem:[%s1623_s3 + $0xa0] sm:$0xff] }
  0x24   :  { %409 = vmatpush.bf16.msrb.mxu0 %v891_v40  ;;  %365 = vmatmul.bf16.vlgmr.msra.gmra.mxu2 %v1434_v46  ;;  %v1139_v22 = vld [vmem:[%s1623_s3 + $0x18] sm:$0xff]  ;;  %v811_v23 = vor.u32 %v1097_v18, %v808_v19  ;;  %v1149_v26 = vld [vmem:[%s1623_s3 + $0x68] sm:$0xff]  ;;  %v1146_v36 = vld [vmem:[%s1623_s3 + $0x50] sm:$0xff] }
  0x25   :  { %387 = vmatpush.bf16.msrb.mxu1 %v823_v41  ;;  %426 = vmatpush.bf16.msrb.mxu2 %v955_v45  ;;  %v792_v25 = vld [vmem:[%s1621_s1 + $0x38] sm:$0xf0]  ;;  %v1089_v28 = vld [vmem:[%s1621_s1 + $0xc] sm:$0xf]  ;;  %v1136_v37 = vld [vmem:[%s1623_s3] sm:$0xff] }
  0x26   :  { %403 = vmatpush.bf16.msrb.mxu3 %v903_v48  ;;  %v795_v27 = vor.u32 %v1093_v24, %v792_v25  ;;  %v776_v29 = vld [vmem:[%s1621_s1 + $0x18] sm:$0xf0]  ;;  %v1157_v32 = vld [vmem:[%s1623_s3 + $0xa8] sm:$0xff]  ;;  %v1154_v41 = vld [vmem:[%s1623_s3 + $0x90] sm:$0xff] }
  0x27   :  { %v779_v31 = vor.u32 %v1089_v28, %v776_v29  ;;  %v1147_v33 = vld [vmem:[%s1623_s3 + $0x58] sm:$0xff]  ;;  %v1137_v34 = vld [vmem:[%s1623_s3 + $0x8] sm:$0xff]  ;;  %v1166_v42 = vld [vmem:[%s1623_s3 + $0xf0] sm:$0xff] }
  0x28   :  { %410 = vmatpush.bf16.msrb.mxu0 %v875_v51  ;;  %v1155_v38 = vld [vmem:[%s1623_s3 + $0x98] sm:$0xff]  ;;  %v1145_v40 = vld [vmem:[%s1623_s3 + $0x48] sm:$0xff]  ;;  %v1144_v43 = vld [vmem:[%s1623_s3 + $0x40] sm:$0xff] }
  0x29   :  { %388 = vmatpush.bf16.msrb.mxu1 %v807_v53  ;;  %427 = vmatpush.bf16.msrb.mxu2 %v939_v57  ;;  %v1167_v39 = vld [vmem:[%s1623_s3 + $0xf8] sm:$0xff]  ;;  %v1153_v44 = vld [vmem:[%s1623_s3 + $0x88] sm:$0xff]  ;;  %v1152_v47 = vld [vmem:[%s1623_s3 + $0x80] sm:$0xff] }
  0x2a   :  { %699 = vmatpush.bf16.msra.mxu3 %v1143_v52  ;;  %v1165_v45 = vld [vmem:[%s1623_s3 + $0xe8] sm:$0xff]  ;;  %v1164_v48 = vld [vmem:[%s1623_s3 + $0xe0] sm:$0xff]  ;;  %v1163_v49 = vld [vmem:[%s1623_s3 + $0xd8] sm:$0xff] }
  0x2b   :  { %958 = vmatmul.msk.bf16.vlgmr.msrb.gmra.mxu3 %vm327_vm0, %v1338_v1  ;;  %v1162_v50 = vld [vmem:[%s1623_s3 + $0xd0] sm:$0xff]  ;;  %v77_v52 = vld [vmem:[%s1624_s2] sm:$0xf]  ;;  %v1161_v55 = vld [vmem:[%s1623_s3 + $0xc8] sm:$0xff] }
  0x2c   :  { %411 = vmatpush.bf16.msrb.mxu0 %v859_v62  ;;  %v79_v54 = vperm.slane %v77_v52, 0  ;;  %v1160_v58 = vld [vmem:[%s1623_s3 + $0xc0] sm:$0xff]  ;;  %v80_v60 = vperm.slane %v77_v52, 1  ;;  %v81_v5 = vperm.slane %v77_v52, 2  ;;  %v82_v18 = vperm.slane %v77_v52, 3 }
  0x2d   :  { %389 = vmatpush.bf16.msrb.mxu1 %v791_v63  ;;  %428 = vmatpush.bf16.msrb.mxu2 %v923_v4 }
  0x2e   :  { %700 = vmatpush.bf16.msra.mxu3 %v1142_v61 }
  0x30   :  { %412 = vmatpush.bf16.msrb.mxu0 %v843_v9 }
  0x31   :  { %390 = vmatpush.bf16.msrb.mxu1 %v775_v10  ;;  %429 = vmatpush.bf16.msrb.mxu2 %v907_v13 }
  0x32   :  { %701 = vmatpush.bf16.msra.mxu3 %v1141_v8 }
  0x34   :  { %391 = vmatmul.bf16.vlgmr.msrb.gmra.mxu1 %v1434_v46  ;;  %413 = vmatpush.bf16.msrb.mxu0 %v827_v17 }
  0x35   :  { %712 = vmatpush.bf16.msra.mxu1 %v1151_v14  ;;  %725 = vmatpush.bf16.msra.mxu2 %v1159_v15 }
  0x36   :  { %702 = vmatpush.bf16.msra.mxu3 %v1140_v16  ;;  %959 = vmatmul.msk.bf16.vlgmr.msrb.gmra.mxu2 %vm327_vm0, %v1338_v1  ;;  %v1138_v1 = vld [vmem:[%s1623_s3 + $0x10] sm:$0xff] }
  0x38   :  { %414 = vmatpush.bf16.msrb.mxu0 %v811_v23 }
  0x39   :  { %713 = vmatpush.bf16.msra.mxu1 %v1150_v20  ;;  %726 = vmatpush.bf16.msra.mxu2 %v1158_v21 }
  0x3a   :  { %703 = vmatpush.bf16.msra.mxu3 %v1139_v22 }
  0x3c   :  { %415 = vmatpush.bf16.msrb.mxu0 %v795_v27 }
  0x3d   :  { %714 = vmatpush.bf16.msra.mxu1 %v1149_v26  ;;  %727 = vmatpush.bf16.msra.mxu2 %v1157_v32 }
  0x3e   :  { %704 = vmatpush.bf16.msra.mxu3 %v1138_v1 }
  0x40   :  { %416 = vmatpush.bf16.msrb.mxu0 %v779_v31 }
  0x41   :  { %715 = vmatpush.bf16.msra.mxu1 %v1148_v30  ;;  %728 = vmatpush.bf16.msra.mxu2 %v1156_v35 }
  0x42   :  { %705 = vmatpush.bf16.msra.mxu3 %v1137_v34  ;;  %v751_v34 = vld [vmem:[%s1625_s4] sm:$0xff] }
  0x43   :  { %417 = vmatmul.bf16.vlgmr.msrb.gmra.mxu0 %v1434_v46 }
  0x44   :  { %738 = vmatpush.bf16.msra.mxu0 %v1167_v39 }
  0x45   :  { %716 = vmatpush.bf16.msra.mxu1 %v1147_v33  ;;  %729 = vmatpush.bf16.msra.mxu2 %v1155_v38  ;;  %v756_v38 = vstv %s1626_s5 }
  0x46   :  { %706 = vmatpush.bf16.msra.mxu3 %v1136_v37 }
  0x48   :  { %739 = vmatpush.bf16.msra.mxu0 %v1166_v42 }
  0x49   :  { %717 = vmatpush.bf16.msra.mxu1 %v1146_v36  ;;  %730 = vmatpush.bf16.msra.mxu2 %v1154_v41 }
  0x4c   :  { %740 = vmatpush.bf16.msra.mxu0 %v1165_v45 }
  0x4d   :  { %718 = vmatpush.bf16.msra.mxu1 %v1145_v40  ;;  %731 = vmatpush.bf16.msra.mxu2 %v1153_v44 }
  0x50   :  { %741 = vmatpush.bf16.msra.mxu0 %v1164_v48 }
  0x51   :  { %719 = vmatpush.bf16.msra.mxu1 %v1144_v43  ;;  %732 = vmatpush.bf16.msra.mxu2 %v1152_v47 }
  0x54   :  { %742 = vmatpush.bf16.msra.mxu0 %v1163_v49 }
  0x58   :  { %743 = vmatpush.bf16.msra.mxu0 %v1162_v50 }
  0x5c   :  { %744 = vmatpush.bf16.msra.mxu0 %v1161_v55 }
  0x60   :  { %745 = vmatpush.bf16.msra.mxu0 %v1160_v58 }
  0x91   :  { %v353_v46 = vpop.f32.mrf.mxu1 }
  0x99   :  { %v355_v51 = vpop.f32.mrf.mxu1 }
  0x9e   :  { %v379_v53 = vpop.f32.mrf.mxu3 }
  0xa0   :  { %v340_v56 = vpop.f32.mrf.mxu0 }
  0xa1   :  { %v341_v57 = vadd.f32 %v340_v56, %v79_v54 }
  0xa3   :  { %v354_v59 = vadd.f32 %v353_v46, %v341_v57 }
  0xa5   :  { %v435_v62 = vmax.f32 %v354_v59, 0.0 }
  0xa6   :  { %v381_v61 = vpop.f32.mrf.mxu3 }
  0xa7   :  { %v439_v63 = vpack.c.bf16 %v435_v62, %v435_v62  ;;  %v366_v0 = vpop.f32.mrf.mxu2 }
  0xa8   :  { %v367_v2 = vadd.f32 %v366_v0, %v80_v60  ;;  %v342_v3 = vpop.f32.mrf.mxu0 }
  0xa9   :  { %707 = vmatmul.bf16.vlgmr.msra.gmra.mxu3 %v439_v63 }
  0xaa   :  { %v380_v4 = vadd.f32 %v379_v53, %v367_v2 }
  0xac   :  { %v436_v6 = vmax.f32 %v380_v4, 0.0 }
  0xae   :  { %v405_v7 = vpop.f32.mrf.mxu3  ;;  %v440_v8 = vpack.c.bf16 %v436_v6, %v436_v6 }
  0xaf   :  { %v368_v11 = vpop.f32.mrf.mxu2 }
  0xb0   :  { %720 = vmatmul.bf16.vlgmr.msra.gmra.mxu1 %v440_v8 }
  0xb1   :  { %v392_v9 = vpop.f32.mrf.mxu1 }
  0xb2   :  { %v393_v10 = vadd.f32 %v392_v9, %v81_v5 }
  0xb4   :  { %v406_v12 = vadd.f32 %v405_v7, %v393_v10 }
  0xb6   :  { %v437_v13 = vmax.f32 %v406_v12, 0.0  ;;  %v407_v14 = vpop.f32.mrf.mxu3 }
  0xb8   :  { %v441_v15 = vpack.c.bf16 %v437_v13, %v437_v13 }
  0xb9   :  { %v394_v16 = vpop.f32.mrf.mxu1  ;;  %v431_v17 = vpop.f32.mrf.mxu2 }
  0xba   :  { %733 = vmatmul.bf16.vlgmr.msra.gmra.mxu2 %v441_v15 }
  0xc0   :  { %v418_v19 = vpop.f32.mrf.mxu0 }
  0xc1   :  { %v419_v20 = vadd.f32 %v418_v19, %v82_v18  ;;  %v433_v21 = vpop.f32.mrf.mxu2 }
  0xc3   :  { %v432_v22 = vadd.f32 %v431_v17, %v419_v20 }
  0xc5   :  { %v438_v23 = vmax.f32 %v432_v22, 0.0 }
  0xc7   :  { %v442_v24 = vpack.c.bf16 %v438_v23, %v438_v23 }
  0xc8   :  { %v420_v25 = vpop.f32.mrf.mxu0 }
  0xc9   :  { %746 = vmatmul.bf16.vlgmr.msra.gmra.mxu0 %v442_v24 }
 0x12c   :  { %v708_v26 = vpop.f32.mrf.mxu3 }
 0x12d   :  { %v721_v27 = vpop.f32.mrf.mxu1 }
 0x12e   :  { %v722_v31 = vadd.f32 %v721_v27, %v708_v26 }
 0x134   :  { %v710_v28 = vpop.f32.mrf.mxu3 }
 0x135   :  { %v723_v29 = vpop.f32.mrf.mxu1 }
 0x13d   :  { %v734_v30 = vpop.f32.mrf.mxu2 }
 0x13e   :  { %v735_v1 = vadd.f32 %v734_v30, %v722_v31 }
 0x145   :  { %v736_v32 = vpop.f32.mrf.mxu2 }
 0x146   :  { %v747_v33 = vpop.f32.mrf.mxu0 }
 0x147   :  { %v748_v35 = vadd.f32 %v747_v33, %v735_v1 }
 0x149   :  { %v752_v36 = vmul.f32 %v751_v34, %v748_v35 }
 0x14b   :  { %753 = vadd.xlane.f32.xlu0 %v752_v36 }
 0x14e   :  { %v749_v37 = vpop.f32.mrf.mxu0 }
 0x1be   :  { %v754_v39 = vpop.xlane.xlu0 %753 }
 0x1bf   :  { %v757_v40 = vadd.f32 %v756_v38, %v754_v39 }
 0x1c1   :  { %759 = vst.msk [vmem:[%s1627_s6] sm:$0xff] %vm758_vm1, %v757_v40 }

// kernel: g_d_forward.2
= control target key start
LH: loop header
LB: loop body
LE: loop exit
PB: predicated region body
PF: predicated region fallthrough
CT: control target
= control target key end

     0   :  { %vm79_vm0 = vcmask 130048   ;;  %vm175_vm1 = vcmask 261120   ;;  %vm1049_vm2 = vcmask 523264   ;;  %vm1480_vm3 = vcmask 7168   ;;  %s3241_s3 = inlined_call_operand.vmem [shape: bf16[16,512], index: 3, kind: input, shape index: {}]   ;;  %s3242_s1 = inlined_call_operand.vmem [shape: f32[8,16], index: 1, kind: input, shape index: {}]   ;;  %s3243_s2 = inlined_call_operand.vmem [shape: bf16[32,512], index: 2, kind: input, shape index: {}]   ;;  %s3244_s5 = inlined_call_operand.vmem [shape: bf16[512,192], index: 5, kind: input, shape index: {}]   ;;  %s3245_s0 = inlined_call_operand.vmem [shape: f32[8,32], index: 0, kind: input, shape index: {}]   ;;  %s3246_s4 = inlined_call_operand.vmem [shape: f32[1,512], index: 4, kind: input, shape index: {}]   ;;  %s3247_s7 = inlined_call_operand.vmem [shape: bf16[192,512], index: 7, kind: input, shape index: {}]   ;;  %s3248_s6 = inlined_call_operand.vmem [shape: f32[1,192], index: 6, kind: input, shape index: {}]   ;;  %s3249_s9 = inlined_call_operand.vmem [shape: bf16[512,128], index: 9, kind: input, shape index: {}]   ;;  %s3250_s8 = inlined_call_operand.vmem [shape: f32[1,512], index: 8, kind: input, shape index: {}]   ;;  %s3251_s10 = inlined_call_operand.vmem [shape: f32[8,128], index: 10, kind: input, shape index: {}]   ;;  %s3252_s11 = inlined_call_operand.<no memory space> [shape: f32[1], index: 11, kind: input, shape index: {}]   ;;  %s3253_s12 = inlined_call_operand.vmem [shape: f32[8,1], index: 12, kind: output, shape index: {}]  }
   0x1   :  { %v2130_v0 = vld [vmem:[%s3241_s3 + $0x4] sm:$0xf]  ;;  %v1490_v1 = vld [vmem:[%s3241_s3 + $0x10] sm:$0xf0]  ;;  %v1496_v2 = vld [vmem:[%s3241_s3 + $0x8] sm:$0xf] }
   0x2   :  { %v1493_v3 = vor.u32 %v2130_v0, %v1490_v1  ;;  %v2133_v4 = vld [vmem:[%s3241_s3 + $0x14] sm:$0xf0]  ;;  %v2131_v5 = vld [vmem:[%s3241_s3 + $0xc] sm:$0xf]  ;;  %v1498_v6 = vld [vmem:[%s3241_s3 + $0x18] sm:$0xf0] }
   0x3   :  { %v1497_v7 = vor.u32 %v2133_v4, %v1496_v2  ;;  %v1501_v8 = vor.u32 %v2131_v5, %v1498_v6  ;;  %v53_v9 = vld [vmem:[%s3242_s1] sm:$0xff]  ;;  %v2128_v11 = vld [vmem:[%s3243_s2 + $0x2c] sm:$0xf0]  ;;  %v1526_v17 = vld [vmem:[%s3243_s2 + $0x30] sm:$0xf0] }
   0x4   :  { %v1524_v10 = vld [vmem:[%s3243_s2 + $0x20] sm:$0xf]  ;;  %103 = vmatpush.bf16.msra.mxu1 %v1493_v3  ;;  %v54_v12 = vpack.c.bf16 %v53_v9, %v53_v9  ;;  %v2124_v15 = vld [vmem:[%s3243_s2 + $0xc] sm:$0xf0]  ;;  %v2126_v16 = vld [vmem:[%s3243_s2 + $0x24] sm:$0xf] }
   0x5   :  { %v1525_v13 = vor.u32 %v2128_v11, %v1524_v10  ;;  %v1508_v14 = vld [vmem:[%s3243_s2] sm:$0xf]  ;;  %116 = vmatpush.bf16.msra.mxu2 %v1497_v7  ;;  %129 = vmatpush.bf16.msra.mxu3 %v1501_v8  ;;  %v1532_v18 = vld [vmem:[%s3243_s2 + $0x28] sm:$0xf]  ;;  %v2129_v19 = vld [vmem:[%s3243_s2 + $0x34] sm:$0xf0]  ;;  %v1529_v21 = vor.u32 %v2126_v16, %v1526_v17 }
   0x6   :  { %v1509_v20 = vor.u32 %v2124_v15, %v1508_v14  ;;  %v1533_v22 = vor.u32 %v2129_v19, %v1532_v18  ;;  %v2122_v23 = vld [vmem:[%s3243_s2 + $0x4] sm:$0xf]  ;;  %v1510_v24 = vld [vmem:[%s3243_s2 + $0x10] sm:$0xf0]  ;;  %v1516_v25 = vld [vmem:[%s3243_s2 + $0x8] sm:$0xf] }
   0x7   :  { %1503 = vmatmul.msk.bf16.vlgmr.msra.gmra.mxu1 %vm79_vm0, %v54_v12  ;;  %v2125_v26 = vld [vmem:[%s3243_s2 + $0x14] sm:$0xf0]  ;;  %v2127_v27 = vld [vmem:[%s3243_s2 + $0x2c] sm:$0xf]  ;;  %v1513_v28 = vor.u32 %v2122_v23, %v1510_v24  ;;  %v1534_v29 = vld [vmem:[%s3243_s2 + $0x38] sm:$0xf0] }
   0x8   :  { %1504 = vmatmul.msk.bf16.vlgmr.msra.gmra.mxu2 %vm79_vm0, %v54_v12  ;;  %1505 = vmatmul.msk.bf16.vlgmr.msra.gmra.mxu3 %vm79_vm0, %v54_v12  ;;  %v1488_v30 = vld [vmem:[%s3241_s3] sm:$0xf]  ;;  %v2132_v31 = vld [vmem:[%s3241_s3 + $0xc] sm:$0xf0]  ;;  %v1517_v32 = vor.u32 %v2125_v26, %v1516_v25  ;;  %v1537_v33 = vor.u32 %v2127_v27, %v1534_v29  ;;  %v2123_v35 = vld [vmem:[%s3243_s2 + $0xc] sm:$0xf] }
   0x9   :  { %185 = vmatpush.bf16.msrb.mxu3 %v1525_v13  ;;  %198 = vmatpush.bf16.msrb.mxu1 %v1529_v21  ;;  %v1489_v34 = vor.u32 %v2132_v31, %v1488_v30  ;;  %v1518_v36 = vld [vmem:[%s3243_s2 + $0x18] sm:$0xf0]  ;;  %v1664_v37 = vld [vmem:[%s3244_s5 + $0xf0] sm:$0xf]  ;;  %v2165_v38 = vld [vmem:[%s3244_s5 + $0xf4] sm:$0xf0] }
   0xa   :  { %211 = vmatpush.bf16.msrb.mxu2 %v1533_v22  ;;  %v1656_v39 = vld [vmem:[%s3244_s5 + $0xe0] sm:$0xf]  ;;  %v2163_v40 = vld [vmem:[%s3244_s5 + $0xe4] sm:$0xf0]  ;;  %v1521_v41 = vor.u32 %v2123_v35, %v1518_v36  ;;  %v1665_v42 = vor.u32 %v2165_v38, %v1664_v37  ;;  %v1600_v43 = vld [vmem:[%s3244_s5 + $0x70] sm:$0xf] }
   0xb   :  { %90 = vmatpush.bf16.msra.mxu0 %v1489_v34  ;;  %v2149_v44 = vld [vmem:[%s3244_s5 + $0x74] sm:$0xf0]  ;;  %v1728_v45 = vld [vmem:[%s3244_s5 + $0x170] sm:$0xf]  ;;  %v1592_v49 = vld [vmem:[%s3244_s5 + $0x60] sm:$0xf]  ;;  %v1657_v52 = vor.u32 %v2163_v40, %v1656_v39 }
   0xc   :  { %v1601_v46 = vor.u32 %v2149_v44, %v1600_v43  ;;  %v2181_v47 = vld [vmem:[%s3244_s5 + $0x174] sm:$0xf0]  ;;  %v2147_v50 = vld [vmem:[%s3244_s5 + $0x64] sm:$0xf0]  ;;  %v1720_v51 = vld [vmem:[%s3244_s5 + $0x160] sm:$0xf] }
   0xd   :  { %186 = vmatpush.bf16.msrb.mxu3 %v1509_v20  ;;  %199 = vmatpush.bf16.msrb.mxu1 %v1513_v28  ;;  %v1729_v48 = vor.u32 %v2181_v47, %v1728_v45  ;;  %v2179_v53 = vld [vmem:[%s3244_s5 + $0x164] sm:$0xf0]  ;;  %v1648_v54 = vld [vmem:[%s3244_s5 + $0xd0] sm:$0xf]  ;;  %v2161_v55 = vld [vmem:[%s3244_s5 + $0xd4] sm:$0xf0]  ;;  %v1593_v56 = vor.u32 %v2147_v50, %v1592_v49 }
   0xe   :  { %212 = vmatpush.bf16.msrb.mxu2 %v1517_v32  ;;  %1502 = vmatmul.msk.bf16.vlgmr.msra.gmra.mxu0 %vm79_vm0, %v54_v12  ;;  %v43_v57 = vld [vmem:[%s3245_s0] sm:$0xff]  ;;  %v1721_v58 = vor.u32 %v2179_v53, %v1720_v51  ;;  %v1584_v59 = vld [vmem:[%s3244_s5 + $0x50] sm:$0xf]  ;;  %v2145_v60 = vld [vmem:[%s3244_s5 + $0x54] sm:$0xf0]  ;;  %v1649_v61 = vor.u32 %v2161_v55, %v1648_v54 }
   0xf   :  { %643 = vmatpush.bf16.msrb.mxu0 %v1601_v46  ;;  %v1712_v62 = vld [vmem:[%s3244_s5 + $0x150] sm:$0xf]  ;;  %v2177_v63 = vld [vmem:[%s3244_s5 + $0x154] sm:$0xf0]  ;;  %v44_v0 = vpack.c.bf16 %v43_v57, %v43_v57  ;;  %v1640_v1 = vld [vmem:[%s3244_s5 + $0xc0] sm:$0xf]  ;;  %v1585_v3 = vor.u32 %v2145_v60, %v1584_v59 }
  0x10   :  { %v2159_v2 = vld [vmem:[%s3244_s5 + $0xc4] sm:$0xf0]  ;;  %v1576_v4 = vld [vmem:[%s3244_s5 + $0x40] sm:$0xf]  ;;  %v1713_v6 = vor.u32 %v2177_v63, %v1712_v62  ;;  %v1632_v10 = vld [vmem:[%s3244_s5 + $0xb0] sm:$0xf] }
  0x11   :  { %224 = vmatpush.bf16.msra.mxu3 %v1537_v33  ;;  %656 = vmatpush.bf16.msra.mxu1 %v1665_v42  ;;  %v2143_v5 = vld [vmem:[%s3244_s5 + $0x44] sm:$0xf0]  ;;  %v1641_v7 = vor.u32 %v2159_v2, %v1640_v1  ;;  %v1704_v8 = vld [vmem:[%s3244_s5 + $0x140] sm:$0xf]  ;;  %v2157_v11 = vld [vmem:[%s3244_s5 + $0xb4] sm:$0xf0] }
  0x12   :  { %669 = vmatpush.bf16.msra.mxu2 %v1729_v48  ;;  %v2175_v9 = vld [vmem:[%s3244_s5 + $0x144] sm:$0xf0]  ;;  %v1577_v12 = vor.u32 %v2143_v5, %v1576_v4  ;;  %v1633_v14 = vor.u32 %v2157_v11, %v1632_v10  ;;  %v1624_v15 = vld [vmem:[%s3244_s5 + $0xa0] sm:$0xf]  ;;  %v1568_v18 = vld [vmem:[%s3244_s5 + $0x30] sm:$0xf] }
  0x13   :  { %644 = vmatpush.bf16.msrb.mxu0 %v1593_v56  ;;  %v1705_v13 = vor.u32 %v2175_v9, %v1704_v8  ;;  %v2155_v16 = vld [vmem:[%s3244_s5 + $0xa4] sm:$0xf0]  ;;  %v2141_v19 = vld [vmem:[%s3244_s5 + $0x34] sm:$0xf0]  ;;  %v1696_v20 = vld [vmem:[%s3244_s5 + $0x130] sm:$0xf] }
  0x14   :  { %v1625_v17 = vor.u32 %v2155_v16, %v1624_v15  ;;  %v1569_v21 = vor.u32 %v2141_v19, %v1568_v18  ;;  %v2173_v22 = vld [vmem:[%s3244_s5 + $0x134] sm:$0xf0]  ;;  %v1792_v23 = vld [vmem:[%s3244_s5 + $0x1f0] sm:$0xf]  ;;  %v1560_v30 = vld [vmem:[%s3244_s5 + $0x20] sm:$0xf] }
  0x15   :  { %225 = vmatpush.bf16.msra.mxu3 %v1521_v41  ;;  %657 = vmatpush.bf16.msra.mxu1 %v1657_v52  ;;  %v2197_v24 = vld [vmem:[%s3244_s5 + $0x1f4] sm:$0xf0]  ;;  %v1697_v25 = vor.u32 %v2173_v22, %v1696_v20  ;;  %v1616_v27 = vld [vmem:[%s3244_s5 + $0x90] sm:$0xf]  ;;  %v2139_v31 = vld [vmem:[%s3244_s5 + $0x24] sm:$0xf0] }
  0x16   :  { %670 = vmatpush.bf16.msra.mxu2 %v1721_v58  ;;  %v1793_v26 = vor.u32 %v2197_v24, %v1792_v23  ;;  %v2153_v28 = vld [vmem:[%s3244_s5 + $0x94] sm:$0xf0]  ;;  %v1688_v32 = vld [vmem:[%s3244_s5 + $0x120] sm:$0xf]  ;;  %v1561_v33 = vor.u32 %v2139_v31, %v1560_v30  ;;  %v2171_v34 = vld [vmem:[%s3244_s5 + $0x124] sm:$0xf0] }
  0x17   :  { %1539 = vmatmul.msk.bf16.vlgmr.msrb.gmra.mxu1 %vm175_vm1, %v44_v0  ;;  %645 = vmatpush.bf16.msrb.mxu0 %v1585_v3  ;;  %v1617_v29 = vor.u32 %v2153_v28, %v1616_v27  ;;  %v1784_v35 = vld [vmem:[%s3244_s5 + $0x1e0] sm:$0xf]  ;;  %v2195_v36 = vld [vmem:[%s3244_s5 + $0x1e4] sm:$0xf0]  ;;  %v1689_v37 = vor.u32 %v2171_v34, %v1688_v32  ;;  %v2164_v42 = vld [vmem:[%s3244_s5 + $0xf4] sm:$0xf] }
  0x18   :  { %1538 = vmatmul.msk.bf16.vlgmr.msrb.gmra.mxu3 %vm175_vm1, %v44_v0  ;;  %1540 = vmatmul.msk.bf16.vlgmr.msrb.gmra.mxu2 %vm175_vm1, %v44_v0  ;;  %v1785_v38 = vor.u32 %v2195_v36, %v1784_v35  ;;  %v1608_v39 = vld [vmem:[%s3244_s5 + $0x80] sm:$0xf]  ;;  %v2151_v40 = vld [vmem:[%s3244_s5 + $0x84] sm:$0xf0]  ;;  %v1666_v43 = vld [vmem:[%s3244_s5 + $0xf8] sm:$0xf0] }
  0x19   :  { %658 = vmatpush.bf16.msra.mxu1 %v1649_v61  ;;  %682 = vmatpush.bf16.msrb.mxu3 %v1793_v26  ;;  %v1609_v41 = vor.u32 %v2151_v40, %v1608_v39  ;;  %v1552_v44 = vld [vmem:[%s3244_s5 + $0x10] sm:$0xf]  ;;  %v1669_v45 = vor.u32 %v2164_v42, %v1666_v43  ;;  %v2137_v46 = vld [vmem:[%s3244_s5 + $0x14] sm:$0xf0]  ;;  %v2162_v54 = vld [vmem:[%s3244_s5 + $0xe4] sm:$0xf] }
  0x1a   :  { %671 = vmatpush.bf16.msra.mxu2 %v1713_v6  ;;  %v1680_v47 = vld [vmem:[%s3244_s5 + $0x110] sm:$0xf]  ;;  %v2169_v48 = vld [vmem:[%s3244_s5 + $0x114] sm:$0xf0]  ;;  %v1553_v49 = vor.u32 %v2137_v46, %v1552_v44  ;;  %v1658_v55 = vld [vmem:[%s3244_s5 + $0xe8] sm:$0xf0] }
  0x1b   :  { %646 = vmatpush.bf16.msrb.mxu0 %v1577_v12  ;;  %v1681_v50 = vor.u32 %v2169_v48, %v1680_v47  ;;  %v1776_v51 = vld [vmem:[%s3244_s5 + $0x1d0] sm:$0xf]  ;;  %v2193_v52 = vld [vmem:[%s3244_s5 + $0x1d4] sm:$0xf0]  ;;  %v1661_v56 = vor.u32 %v2162_v54, %v1658_v55  ;;  %v1544_v57 = vld [vmem:[%s3244_s5] sm:$0xf] }
  0x1c   :  { %v1777_v53 = vor.u32 %v2193_v52, %v1776_v51  ;;  %v2135_v58 = vld [vmem:[%s3244_s5 + $0x4] sm:$0xf0]  ;;  %v1672_v59 = vld [vmem:[%s3244_s5 + $0x100] sm:$0xf]  ;;  %v2148_v2 = vld [vmem:[%s3244_s5 + $0x74] sm:$0xf] }
  0x1d   :  { %659 = vmatpush.bf16.msra.mxu1 %v1641_v7  ;;  %683 = vmatpush.bf16.msrb.mxu3 %v1785_v38  ;;  %v1545_v60 = vor.u32 %v2135_v58, %v1544_v57  ;;  %v2167_v61 = vld [vmem:[%s3244_s5 + $0x104] sm:$0xf0]  ;;  %v1768_v62 = vld [vmem:[%s3244_s5 + $0x1c0] sm:$0xf]  ;;  %v1602_v3 = vld [vmem:[%s3244_s5 + $0x78] sm:$0xf0] }
  0x1e   :  { %672 = vmatpush.bf16.msra.mxu2 %v1705_v13  ;;  %v2191_v63 = vld [vmem:[%s3244_s5 + $0x1c4] sm:$0xf0]  ;;  %v2180_v4 = vld [vmem:[%s3244_s5 + $0x174] sm:$0xf]  ;;  %v1605_v5 = vor.u32 %v2148_v2, %v1602_v3  ;;  %v1730_v6 = vld [vmem:[%s3244_s5 + $0x178] sm:$0xf0] }
  0x1f   :  { %647 = vmatpush.bf16.msrb.mxu0 %v1569_v21  ;;  %v1769_v1 = vor.u32 %v2191_v63, %v1768_v62  ;;  %v2160_v7 = vld [vmem:[%s3244_s5 + $0xd4] sm:$0xf]  ;;  %v1650_v8 = vld [vmem:[%s3244_s5 + $0xd8] sm:$0xf0]  ;;  %v1733_v9 = vor.u32 %v2180_v4, %v1730_v6  ;;  %v1760_v11 = vld [vmem:[%s3244_s5 + $0x1b0] sm:$0xf] }
  0x20   :  { %v1653_v10 = vor.u32 %v2160_v7, %v1650_v8  ;;  %v2189_v12 = vld [vmem:[%s3244_s5 + $0x1b4] sm:$0xf0]  ;;  %v1594_v15 = vld [vmem:[%s3244_s5 + $0x68] sm:$0xf0]  ;;  %v2158_v20 = vld [vmem:[%s3244_s5 + $0xc4] sm:$0xf] }
  0x21   :  { %660 = vmatpush.bf16.msra.mxu1 %v1633_v14  ;;  %684 = vmatpush.bf16.msrb.mxu3 %v1777_v53  ;;  %v1761_v13 = vor.u32 %v2189_v12, %v1760_v11  ;;  %v2146_v14 = vld [vmem:[%s3244_s5 + $0x64] sm:$0xf]  ;;  %v1722_v18 = vld [vmem:[%s3244_s5 + $0x168] sm:$0xf0]  ;;  %v1752_v23 = vld [vmem:[%s3244_s5 + $0x1a0] sm:$0xf] }
  0x22   :  { %673 = vmatpush.bf16.msra.mxu2 %v1697_v25  ;;  %v1597_v16 = vor.u32 %v2146_v14, %v1594_v15  ;;  %v1642_v21 = vld [vmem:[%s3244_s5 + $0xc8] sm:$0xf0]  ;;  %v2187_v24 = vld [vmem:[%s3244_s5 + $0x1a4] sm:$0xf0]  ;;  %v2144_v26 = vld [vmem:[%s3244_s5 + $0x54] sm:$0xf] }
  0x23   :  { %648 = vmatpush.bf16.msrb.mxu0 %v1561_v33  ;;  %v1645_v22 = vor.u32 %v2158_v20, %v1642_v21  ;;  %v1753_v25 = vor.u32 %v2187_v24, %v1752_v23  ;;  %v1586_v27 = vld [vmem:[%s3244_s5 + $0x58] sm:$0xf0]  ;;  %v2176_v28 = vld [vmem:[%s3244_s5 + $0x154] sm:$0xf]  ;;  %v1744_v35 = vld [vmem:[%s3244_s5 + $0x190] sm:$0xf] }
  0x24   :  { %v1714_v30 = vld [vmem:[%s3244_s5 + $0x158] sm:$0xf0]  ;;  %v2156_v32 = vld [vmem:[%s3244_s5 + $0xb4] sm:$0xf]  ;;  %v2185_v36 = vld [vmem:[%s3244_s5 + $0x194] sm:$0xf0] }
  0x25   :  { %661 = vmatpush.bf16.msra.mxu1 %v1625_v17  ;;  %685 = vmatpush.bf16.msrb.mxu3 %v1769_v1  ;;  %v2178_v17 = vld [vmem:[%s3244_s5 + $0x164] sm:$0xf]  ;;  %v1717_v31 = vor.u32 %v2176_v28, %v1714_v30  ;;  %v1634_v33 = vld [vmem:[%s3244_s5 + $0xb8] sm:$0xf0]  ;;  %v1578_v39 = vld [vmem:[%s3244_s5 + $0x48] sm:$0xf0] }
  0x26   :  { %674 = vmatpush.bf16.msra.mxu2 %v1689_v37  ;;  %v1725_v19 = vor.u32 %v2178_v17, %v1722_v18  ;;  %v1637_v34 = vor.u32 %v2156_v32, %v1634_v33  ;;  %v1745_v37 = vor.u32 %v2185_v36, %v1744_v35  ;;  %v2142_v38 = vld [vmem:[%s3244_s5 + $0x44] sm:$0xf]  ;;  %v1706_v42 = vld [vmem:[%s3244_s5 + $0x148] sm:$0xf0]  ;;  %v1736_v47 = vld [vmem:[%s3244_s5 + $0x180] sm:$0xf] }
  0x27   :  { %649 = vmatpush.bf16.msrb.mxu0 %v1553_v49  ;;  %v2174_v40 = vld [vmem:[%s3244_s5 + $0x144] sm:$0xf]  ;;  %v2183_v48 = vld [vmem:[%s3244_s5 + $0x184] sm:$0xf0]  ;;  %v1570_v51 = vld [vmem:[%s3244_s5 + $0x38] sm:$0xf0] }
  0x28   :  { %1541 = vmatmul.msk.bf16.vlgmr.msra.gmra.mxu3 %vm175_vm1, %v44_v0  ;;  %v1673_v0 = vor.u32 %v2167_v61, %v1672_v59  ;;  %v1709_v43 = vor.u32 %v2174_v40, %v1706_v42  ;;  %v2154_v44 = vld [vmem:[%s3244_s5 + $0xa4] sm:$0xf]  ;;  %v1737_v49 = vor.u32 %v2183_v48, %v1736_v47  ;;  %v2172_v52 = vld [vmem:[%s3244_s5 + $0x134] sm:$0xf]  ;;  %v1698_v54 = vld [vmem:[%s3244_s5 + $0x138] sm:$0xf0] }
  0x29   :  { %662 = vmatpush.bf16.msra.mxu1 %v1617_v29  ;;  %686 = vmatpush.bf16.msrb.mxu3 %v1761_v13  ;;  %v1589_v29 = vor.u32 %v2144_v26, %v1586_v27  ;;  %v2196_v55 = vld [vmem:[%s3244_s5 + $0x1f4] sm:$0xf]  ;;  %v1701_v58 = vor.u32 %v2172_v52, %v1698_v54  ;;  %v1618_v61 = vld [vmem:[%s3244_s5 + $0x98] sm:$0xf0]  ;;  %v2138_v62 = vld [vmem:[%s3244_s5 + $0x24] sm:$0xf] }
  0x2a   :  { %675 = vmatpush.bf16.msra.mxu2 %v1681_v50  ;;  %v2140_v50 = vld [vmem:[%s3244_s5 + $0x34] sm:$0xf]  ;;  %v2170_v1 = vld [vmem:[%s3244_s5 + $0x124] sm:$0xf]  ;;  %v1690_v2 = vld [vmem:[%s3244_s5 + $0x128] sm:$0xf0] }
  0x2b   :  { %650 = vmatpush.bf16.msrb.mxu0 %v1545_v60  ;;  %v1573_v53 = vor.u32 %v2140_v50, %v1570_v51  ;;  %v2152_v60 = vld [vmem:[%s3244_s5 + $0x94] sm:$0xf]  ;;  %v2194_v4 = vld [vmem:[%s3244_s5 + $0x1e4] sm:$0xf]  ;;  %v1693_v6 = vor.u32 %v2170_v1, %v1690_v2  ;;  %v1554_v12 = vld [vmem:[%s3244_s5 + $0x18] sm:$0xf0] }
  0x2c   :  { %v1621_v63 = vor.u32 %v2152_v60, %v1618_v61  ;;  %v2150_v8 = vld [vmem:[%s3244_s5 + $0x84] sm:$0xf]  ;;  %v2136_v11 = vld [vmem:[%s3244_s5 + $0x14] sm:$0xf]  ;;  %v1682_v17 = vld [vmem:[%s3244_s5 + $0x118] sm:$0xf0] }
  0x2d   :  { %663 = vmatpush.bf16.msra.mxu1 %v1609_v41  ;;  %687 = vmatpush.bf16.msrb.mxu3 %v1753_v25  ;;  %v1581_v41 = vor.u32 %v2142_v38, %v1578_v39  ;;  %v2168_v13 = vld [vmem:[%s3244_s5 + $0x114] sm:$0xf]  ;;  %v2134_v24 = vld [vmem:[%s3244_s5 + $0x4] sm:$0xf]  ;;  %v1546_v25 = vld [vmem:[%s3244_s5 + $0x8] sm:$0xf0] }
  0x2e   :  { %676 = vmatpush.bf16.msra.mxu2 %v1673_v0  ;;  %v1562_v0 = vld [vmem:[%s3244_s5 + $0x28] sm:$0xf0]  ;;  %v2192_v18 = vld [vmem:[%s3244_s5 + $0x1d4] sm:$0xf]  ;;  %v2166_v26 = vld [vmem:[%s3244_s5 + $0x104] sm:$0xf]  ;;  %v1549_v27 = vor.u32 %v2134_v24, %v1546_v25 }
  0x2f   :  { %695 = vmatpush.bf16.msra.mxu0 %v1605_v5  ;;  %v1565_v3 = vor.u32 %v2138_v62, %v1562_v0  ;;  %v1786_v5 = vld [vmem:[%s3244_s5 + $0x1e8] sm:$0xf0]  ;;  %v1762_v38 = vld [vmem:[%s3244_s5 + $0x1b8] sm:$0xf0]  ;;  %v2184_v47 = vld [vmem:[%s3244_s5 + $0x194] sm:$0xf] }
  0x30   :  { %v1789_v7 = vor.u32 %v2194_v4, %v1786_v5  ;;  %v1674_v28 = vld [vmem:[%s3244_s5 + $0x108] sm:$0xf0]  ;;  %v1746_v48 = vld [vmem:[%s3244_s5 + $0x198] sm:$0xf0]  ;;  %v2226_v25 = vld [vmem:[%s3247_s7 + $0xe4] sm:$0xf] }
  0x31   :  { %708 = vmatpush.bf16.msrb.mxu1 %v1669_v45  ;;  %v1626_v45 = vld [vmem:[%s3244_s5 + $0xa8] sm:$0xf0]  ;;  %688 = vmatpush.bf16.msrb.mxu3 %v1745_v37  ;;  %v1677_v32 = vor.u32 %v2166_v26, %v1674_v28  ;;  %v2188_v37 = vld [vmem:[%s3244_s5 + $0x1b4] sm:$0xf]  ;;  %v1749_v52 = vor.u32 %v2184_v47, %v1746_v48  ;;  %v1848_v28 = vld [vmem:[%s3247_s7 + $0x60] sm:$0xf] }
  0x32   :  { %721 = vmatpush.bf16.msrb.mxu2 %v1733_v9  ;;  %v1629_v46 = vor.u32 %v2154_v44, %v1626_v45  ;;  %v1610_v9 = vld [vmem:[%s3244_s5 + $0x88] sm:$0xf0]  ;;  %v1914_v26 = vld [vmem:[%s3247_s7 + $0xf0] sm:$0xf0]  ;;  %v2200_v47 = vld [vmem:[%s3247_s7 + $0xc] sm:$0xf0] }
  0x33   :  { %696 = vmatpush.bf16.msra.mxu0 %v1597_v16  ;;  %v1557_v16 = vor.u32 %v2136_v11, %v1554_v12  ;;  %v1770_v30 = vld [vmem:[%s3244_s5 + $0x1c8] sm:$0xf0] }
  0x34   :  { %v1754_v44 = vld [vmem:[%s3244_s5 + $0x1a8] sm:$0xf0] }
  0x35   :  { %709 = vmatpush.bf16.msrb.mxu1 %v1661_v56  ;;  %v1794_v56 = vld [vmem:[%s3244_s5 + $0x1f8] sm:$0xf0]  ;;  %689 = vmatpush.bf16.msrb.mxu3 %v1737_v49 }
  0x36   :  { %722 = vmatpush.bf16.msrb.mxu2 %v1725_v19  ;;  %v1797_v59 = vor.u32 %v2196_v55, %v1794_v56  ;;  %v1778_v19 = vld [vmem:[%s3244_s5 + $0x1d8] sm:$0xf0]  ;;  %v2182_v56 = vld [vmem:[%s3244_s5 + $0x184] sm:$0xf] }
  0x37   :  { %697 = vmatpush.bf16.msra.mxu0 %v1589_v29  ;;  %v1781_v23 = vor.u32 %v2192_v18, %v1778_v19  ;;  %v2190_v29 = vld [vmem:[%s3244_s5 + $0x1c4] sm:$0xf]  ;;  %v2224_v18 = vld [vmem:[%s3247_s7 + $0xcc] sm:$0xf0] }
  0x38   :  { %v1773_v33 = vor.u32 %v2190_v29, %v1770_v30  ;;  %v2212_v29 = vld [vmem:[%s3247_s7 + $0x6c] sm:$0xf0] }
  0x39   :  { %710 = vmatpush.bf16.msrb.mxu1 %v1653_v10  ;;  %734 = vmatpush.bf16.msra.mxu3 %v1797_v59  ;;  %v1613_v10 = vor.u32 %v2150_v8, %v1610_v9  ;;  %v1849_v30 = vor.u32 %v2212_v29, %v1848_v28  ;;  %v2229_v28 = vld [vmem:[%s3247_s7 + $0xf4] sm:$0xf0]  ;;  %v2211_v29 = vld [vmem:[%s3247_s7 + $0x6c] sm:$0xf] }
  0x3a   :  { %723 = vmatpush.bf16.msrb.mxu2 %v1717_v31  ;;  %v231_v31 = vld [vmem:[%s3246_s4] sm:$0xf] }
  0x3b   :  { %698 = vmatpush.bf16.msra.mxu0 %v1581_v41  ;;  %v234_v36 = vperm.slane %v231_v31, 1  ;;  %v1765_v41 = vor.u32 %v2188_v37, %v1762_v38  ;;  %v233_v50 = vperm.slane %v231_v31, 0  ;;  %v235_v51 = vperm.slane %v231_v31, 2  ;;  %v2218_v37 = vld [vmem:[%s3247_s7 + $0xa4] sm:$0xf] }
  0x3c   :  { %v236_v9 = vperm.slane %v231_v31, 3  ;;  %v2222_v31 = vld [vmem:[%s3247_s7 + $0xc4] sm:$0xf]  ;;  %v1882_v38 = vld [vmem:[%s3247_s7 + $0xb0] sm:$0xf0] }
  0x3d   :  { %711 = vmatpush.bf16.msrb.mxu1 %v1645_v22  ;;  %735 = vmatpush.bf16.msra.mxu3 %v1789_v7  ;;  %v1685_v22 = vor.u32 %v2168_v13, %v1682_v17  ;;  %v2228_v7 = vld [vmem:[%s3247_s7 + $0xec] sm:$0xf0]  ;;  %v1896_v17 = vld [vmem:[%s3247_s7 + $0xc0] sm:$0xf] }
  0x3e   :  { %724 = vmatpush.bf16.msrb.mxu2 %v1709_v43  ;;  %v2186_v43 = vld [vmem:[%s3244_s5 + $0x1a4] sm:$0xf]  ;;  %v1897_v19 = vor.u32 %v2224_v18, %v1896_v17  ;;  %v1874_v18 = vld [vmem:[%s3247_s7 + $0x98] sm:$0xf0] }
  0x3f   :  { %699 = vmatpush.bf16.msra.mxu0 %v1573_v53  ;;  %v1757_v45 = vor.u32 %v2186_v43, %v1754_v44  ;;  %v2214_v43 = vld [vmem:[%s3247_s7 + $0x84] sm:$0xf]  ;;  %v1866_v44 = vld [vmem:[%s3247_s7 + $0x90] sm:$0xf0] }
  0x41   :  { %712 = vmatpush.bf16.msrb.mxu1 %v1637_v34  ;;  %736 = vmatpush.bf16.msra.mxu3 %v1781_v23  ;;  %v2216_v23 = vld [vmem:[%s3247_s7 + $0x8c] sm:$0xf0] }
  0x42   :  { %725 = vmatpush.bf16.msrb.mxu2 %v1701_v58 }
  0x43   :  { %700 = vmatpush.bf16.msra.mxu0 %v1565_v3 }
  0x45   :  { %713 = vmatpush.bf16.msrb.mxu1 %v1629_v46  ;;  %737 = vmatpush.bf16.msra.mxu3 %v1773_v33 }
  0x46   :  { %726 = vmatpush.bf16.msrb.mxu2 %v1693_v6  ;;  %v1912_v6 = vld [vmem:[%s3247_s7 + $0xe0] sm:$0xf] }
  0x47   :  { %701 = vmatpush.bf16.msra.mxu0 %v1557_v16  ;;  %v1913_v8 = vor.u32 %v2228_v7, %v1912_v6  ;;  %v2219_v6 = vld [vmem:[%s3247_s7 + $0xac] sm:$0xf] }
  0x49   :  { %714 = vmatpush.bf16.msrb.mxu1 %v1621_v63  ;;  %738 = vmatpush.bf16.msra.mxu3 %v1765_v41  ;;  %v2204_v41 = vld [vmem:[%s3247_s7 + $0x2c] sm:$0xf0] }
  0x4a   :  { %727 = vmatpush.bf16.msrb.mxu2 %v1685_v22  ;;  %v1864_v22 = vld [vmem:[%s3247_s7 + $0x80] sm:$0xf] }
  0x4b   :  { %702 = vmatpush.bf16.msra.mxu0 %v1549_v27  ;;  %v1865_v24 = vor.u32 %v2216_v23, %v1864_v22  ;;  %v1917_v27 = vor.u32 %v2226_v25, %v1914_v26  ;;  %v1978_v25 = vld [vmem:[%s3247_s7 + $0x170] sm:$0xf0]  ;;  %v1920_v26 = vld [vmem:[%s3247_s7 + $0xe8] sm:$0xf] }
  0x4d   :  { %715 = vmatpush.bf16.msrb.mxu1 %v1613_v10  ;;  %739 = vmatpush.bf16.msra.mxu3 %v1757_v45  ;;  %v1869_v45 = vor.u32 %v2214_v43, %v1866_v44  ;;  %v1842_v43 = vld [vmem:[%s3247_s7 + $0x58] sm:$0xf0] }
  0x4e   :  { %728 = vmatpush.bf16.msrb.mxu2 %v1677_v32  ;;  %v1898_v32 = vld [vmem:[%s3247_s7 + $0xd0] sm:$0xf0] }
  0x4f   :  { %v1901_v33 = vor.u32 %v2222_v31, %v1898_v32  ;;  %v1921_v31 = vor.u32 %v2229_v28, %v1920_v26  ;;  %v2241_v26 = vld [vmem:[%s3247_s7 + $0x154] sm:$0xf0] }
  0x51   :  { %740 = vmatpush.bf16.msra.mxu3 %v1749_v52 }
  0x84   :  { %v2727_v57 = vpop.f32.mrf.mxu1 }
  0x8b   :  { %v118_v14 = vpop.f32.mrf.mxu2  ;;  %v2768_v15 = vpop.f32.mrf.mxu3 }
  0x8c   :  { %v107_v20 = vpop.f32.mrf.mxu1  ;;  %v92_v21 = vpop.f32.mrf.mxu0 }
  0x8d   :  { %v2220_v20 = vld [vmem:[%s3247_s7 + $0xac] sm:$0xf0] }
  0x93   :  { %v120_v34 = vpop.f32.mrf.mxu2  ;;  %v133_v35 = vpop.f32.mrf.mxu3 }
  0x94   :  { %v201_v39 = vpop.f32.mrf.mxu1  ;;  %v94_v40 = vpop.f32.mrf.mxu0  ;;  %v1832_v34 = vld [vmem:[%s3247_s7 + $0x40] sm:$0xf]  ;;  %v2208_v35 = vld [vmem:[%s3247_s7 + $0x4c] sm:$0xf0] }
  0x95   :  { %v202_v42 = vadd.f32 %v201_v39, %v2727_v57  ;;  %v1738_v57 = vld [vmem:[%s3244_s5 + $0x188] sm:$0xf0]  ;;  %v1885_v39 = vor.u32 %v2218_v37, %v1882_v38  ;;  %v1816_v40 = vld [vmem:[%s3247_s7 + $0x20] sm:$0xf]  ;;  %v1962_v37 = vld [vmem:[%s3247_s7 + $0x150] sm:$0xf0] }
  0x96   :  { %v1741_v63 = vor.u32 %v2182_v56, %v1738_v57  ;;  %v2244_v56 = vld [vmem:[%s3247_s7 + $0x16c] sm:$0xf0]  ;;  %v1904_v38 = vld [vmem:[%s3247_s7 + $0xc8] sm:$0xf] }
  0x97   :  { %v242_v46 = vadd.f32 %v234_v36, %v202_v42  ;;  %v1833_v36 = vor.u32 %v2208_v35, %v1832_v34  ;;  %v1817_v42 = vor.u32 %v2204_v41, %v1816_v40  ;;  %v1986_v34 = vld [vmem:[%s3247_s7 + $0x178] sm:$0xf0]  ;;  %v2225_v41 = vld [vmem:[%s3247_s7 + $0xd4] sm:$0xf0] }
  0x98   :  { %741 = vmatpush.bf16.msra.mxu3 %v1741_v63  ;;  %v1905_v44 = vor.u32 %v2225_v41, %v1904_v38  ;;  %v1936_v41 = vld [vmem:[%s3247_s7 + $0x108] sm:$0xf] }
  0x99   :  { %v246_v49 = vmax.f32 %v242_v46, 0.0  ;;  %v1800_v46 = vld [vmem:[%s3247_s7] sm:$0xf] }
  0x9a   :  { %v1801_v48 = vor.u32 %v2200_v47, %v1800_v46  ;;  %v2239_v46 = vld [vmem:[%s3247_s7 + $0x14c] sm:$0xf]  ;;  %v1970_v47 = vld [vmem:[%s3247_s7 + $0x158] sm:$0xf0] }
  0x9b   :  { %v250_v53 = vpack.c.bf16 %v246_v49, %v246_v49  ;;  %v188_v54 = vpop.f32.mrf.mxu3  ;;  %v214_v55 = vpop.f32.mrf.mxu2  ;;  %v2210_v49 = vld [vmem:[%s3247_s7 + $0x64] sm:$0xf] }
  0x9c   :  { %v189_v58 = vadd.f32 %v188_v54, %v92_v21  ;;  %v215_v59 = vadd.f32 %v214_v55, %v118_v14  ;;  %v203_v60 = vpop.f32.mrf.mxu1  ;;  %v1976_v55 = vld [vmem:[%s3247_s7 + $0x160] sm:$0xf] }
  0x9d   :  { %664 = vmatmul.bf16.vlgmr.msra.gmra.mxu1 %v250_v53  ;;  %v1977_v57 = vor.u32 %v2244_v56, %v1976_v55  ;;  %v2223_v60 = vld [vmem:[%s3247_s7 + $0xcc] sm:$0xf]  ;;  %v2221_v56 = vld [vmem:[%s3247_s7 + $0xb4] sm:$0xf0] }
  0x9e   :  { %v241_v61 = vadd.f32 %v233_v50, %v189_v58  ;;  %v243_v62 = vadd.f32 %v235_v51, %v215_v59  ;;  %v1850_v50 = vld [vmem:[%s3247_s7 + $0x70] sm:$0xf0]  ;;  %v2227_v51 = vld [vmem:[%s3247_s7 + $0xec] sm:$0xf]  ;;  %v2206_v58 = vld [vmem:[%s3247_s7 + $0x44] sm:$0xf] }
  0x9f   :  { %v1853_v52 = vor.u32 %v2210_v49, %v1850_v50  ;;  %v1834_v59 = vld [vmem:[%s3247_s7 + $0x50] sm:$0xf0]  ;;  %1070 = vmatpush.bf16.msra.mxu1 %v1977_v57  ;;  %v1973_v50 = vor.u32 %v2239_v46, %v1970_v47  ;;  %v2203_v57 = vld [vmem:[%s3247_s7 + $0x2c] sm:$0xf] }
  0xa0   :  { %v245_v0 = vmax.f32 %v241_v61, 0.0  ;;  %v247_v1 = vmax.f32 %v243_v62, 0.0  ;;  %v1837_v61 = vor.u32 %v2206_v58, %v1834_v59  ;;  %v1906_v62 = vld [vmem:[%s3247_s7 + $0xd8] sm:$0xf0] }
  0xa1   :  { %v1909_v63 = vor.u32 %v2223_v60, %v1906_v62  ;;  %v1826_v58 = vld [vmem:[%s3247_s7 + $0x38] sm:$0xf0]  ;;  %v2235_v62 = vld [vmem:[%s3247_s7 + $0x12c] sm:$0xf] }
  0xa2   :  { %v249_v2 = vpack.c.bf16 %v245_v0, %v245_v0  ;;  %v251_v3 = vpack.c.bf16 %v247_v1, %v247_v1  ;;  %v1960_v0 = vld [vmem:[%s3247_s7 + $0x140] sm:$0xf]  ;;  %v2240_v1 = vld [vmem:[%s3247_s7 + $0x14c] sm:$0xf0] }
  0xa3   :  { %v190_v4 = vpop.f32.mrf.mxu3  ;;  %v216_v5 = vpop.f32.mrf.mxu2 }
  0xa4   :  { %651 = vmatmul.bf16.vlgmr.msrb.gmra.mxu0 %v249_v2  ;;  %677 = vmatmul.bf16.vlgmr.msra.gmra.mxu2 %v251_v3  ;;  %v2202_v4 = vld [vmem:[%s3247_s7 + $0x24] sm:$0xf]  ;;  %v1818_v5 = vld [vmem:[%s3247_s7 + $0x30] sm:$0xf0] }
  0xa5   :  { %1053 = vmatpush.bf16.msrb.mxu0 %v1913_v8  ;;  %1079 = vmatpush.bf16.msra.mxu2 %v1917_v27  ;;  %v1821_v7 = vor.u32 %v2202_v4, %v1818_v5  ;;  %v1890_v8 = vld [vmem:[%s3247_s7 + $0xb8] sm:$0xf0]  ;;  %v1872_v4 = vld [vmem:[%s3247_s7 + $0x88] sm:$0xf] }
  0xa9   :  { %1054 = vmatpush.bf16.msrb.mxu0 %v1897_v19  ;;  %1080 = vmatpush.bf16.msra.mxu2 %v1901_v33  ;;  %v2243_v33 = vld [vmem:[%s3247_s7 + $0x16c] sm:$0xf] }
  0xaa   :  { %v1989_v35 = vor.u32 %v2243_v33, %v1986_v34  ;;  %v1824_v34 = vld [vmem:[%s3247_s7 + $0x28] sm:$0xf] }
  0xab   :  { %v227_v10 = vpop.f32.mrf.mxu3 }
  0xac   :  { %v228_v11 = vadd.f32 %v227_v10, %v2768_v15  ;;  %v1880_v15 = vld [vmem:[%s3247_s7 + $0xa0] sm:$0xf] }
  0xad   :  { %716 = vmatmul.bf16.vlgmr.msrb.gmra.mxu1 %v250_v53  ;;  %v1881_v21 = vor.u32 %v2220_v20, %v1880_v15  ;;  %1081 = vmatpush.bf16.msra.mxu2 %v1885_v39  ;;  %v1922_v53 = vld [vmem:[%s3247_s7 + $0xf8] sm:$0xf0]  ;;  %v1944_v10 = vld [vmem:[%s3247_s7 + $0x120] sm:$0xf] }
  0xae   :  { %v244_v12 = vadd.f32 %v236_v9, %v228_v11  ;;  %v1925_v54 = vor.u32 %v2227_v51, %v1922_v53  ;;  %v1893_v9 = vor.u32 %v2219_v6, %v1890_v8  ;;  %v2236_v11 = vld [vmem:[%s3247_s7 + $0x12c] sm:$0xf0]  ;;  %v1928_v20 = vld [vmem:[%s3247_s7 + $0x100] sm:$0xf]  ;;  %v1946_v53 = vld [vmem:[%s3247_s7 + $0x130] sm:$0xf0] }
  0xaf   :  { %1055 = vmatpush.bf16.msrb.mxu0 %v1881_v21  ;;  %v2232_v21 = vld [vmem:[%s3247_s7 + $0x10c] sm:$0xf0]  ;;  %v2199_v8 = vld [vmem:[%s3247_s7 + $0xc] sm:$0xf] }
  0xb0   :  { %v248_v13 = vmax.f32 %v244_v12, 0.0  ;;  %v1945_v12 = vor.u32 %v2236_v11, %v1944_v10  ;;  %v1929_v23 = vor.u32 %v2232_v21, %v1928_v20  ;;  %v1856_v20 = vld [vmem:[%s3247_s7 + $0x68] sm:$0xf] }
  0xb1   :  { %1082 = vmatpush.bf16.msra.mxu2 %v1869_v45 }
  0xb2   :  { %v252_v14 = vpack.c.bf16 %v248_v13, %v248_v13  ;;  %v2198_v13 = vld [vmem:[%s3247_s7 + $0x4] sm:$0xf] }
  0xb3   :  { %v229_v16 = vpop.f32.mrf.mxu3  ;;  %1056 = vmatpush.bf16.msrb.mxu0 %v1865_v24  ;;  %v2242_v24 = vld [vmem:[%s3247_s7 + $0x164] sm:$0xf] }
  0xb4   :  { %690 = vmatmul.bf16.vlgmr.msrb.gmra.mxu3 %v252_v14  ;;  %703 = vmatmul.bf16.vlgmr.msra.gmra.mxu0 %v249_v2  ;;  %v2215_v16 = vld [vmem:[%s3247_s7 + $0x8c] sm:$0xf]  ;;  %v1981_v27 = vor.u32 %v2242_v24, %v1978_v25  ;;  %v1968_v25 = vld [vmem:[%s3247_s7 + $0x148] sm:$0xf] }
  0xb5   :  { %729 = vmatmul.bf16.vlgmr.msrb.gmra.mxu2 %v251_v3  ;;  %v1961_v3 = vor.u32 %v2240_v1, %v1960_v0  ;;  %v1877_v19 = vor.u32 %v2215_v16, %v1874_v18  ;;  %v2230_v1 = vld [vmem:[%s3247_s7 + $0x104] sm:$0xf]  ;;  %v1969_v28 = vor.u32 %v2241_v26, %v1968_v25  ;;  %v2265_v25 = vld [vmem:[%s3249_s9 + $0x98] sm:$0xff] }
  0xb6   :  { %1083 = vmatpush.bf16.msra.mxu2 %v1853_v52  ;;  %1096 = vmatpush.bf16.msrb.mxu3 %v1981_v27  ;;  %v2234_v52 = vld [vmem:[%s3247_s7 + $0x124] sm:$0xf]  ;;  %v1840_v27 = vld [vmem:[%s3247_s7 + $0x48] sm:$0xf] }
  0xb7   :  { %1057 = vmatpush.bf16.msrb.mxu0 %v1849_v30  ;;  %1071 = vmatpush.bf16.msra.mxu1 %v1961_v3  ;;  %v1858_v30 = vld [vmem:[%s3247_s7 + $0x78] sm:$0xf0]  ;;  %v1949_v55 = vor.u32 %v2234_v52, %v1946_v53  ;;  %v1930_v3 = vld [vmem:[%s3247_s7 + $0x110] sm:$0xf0] }
  0xb8   :  { %v1861_v32 = vor.u32 %v2211_v29, %v1858_v30  ;;  %v1933_v6 = vor.u32 %v2230_v1, %v1930_v3  ;;  %v2209_v29 = vld [vmem:[%s3247_s7 + $0x54] sm:$0xf0]  ;;  %v2260_v1 = vld [vmem:[%s3249_s9 + $0x70] sm:$0xff] }
  0xb9   :  { %v1841_v30 = vor.u32 %v2209_v29, %v1840_v27  ;;  %v2276_v3 = vld [vmem:[%s3249_s9 + $0xf0] sm:$0xff] }
  0xba   :  { %1084 = vmatpush.bf16.msra.mxu2 %v1837_v61  ;;  %v1829_v61 = vor.u32 %v2203_v57, %v1826_v58  ;;  %v2264_v27 = vld [vmem:[%s3249_s9 + $0x90] sm:$0xff] }
  0xbb   :  { %1058 = vmatpush.bf16.msrb.mxu0 %v1833_v36  ;;  %1072 = vmatpush.bf16.msra.mxu1 %v1945_v12  ;;  %v2238_v36 = vld [vmem:[%s3247_s7 + $0x144] sm:$0xf] }
  0xbc   :  { %v1965_v40 = vor.u32 %v2238_v36, %v1962_v37 }
  0xbe   :  { %1085 = vmatpush.bf16.msra.mxu2 %v1821_v7  ;;  %1097 = vmatpush.bf16.msrb.mxu3 %v1965_v40  ;;  %v2217_v7 = vld [vmem:[%s3247_s7 + $0x94] sm:$0xf0] }
  0xbf   :  { %1059 = vmatpush.bf16.msrb.mxu0 %v1817_v42  ;;  %1073 = vmatpush.bf16.msra.mxu1 %v1929_v23  ;;  %v2207_v42 = vld [vmem:[%s3247_s7 + $0x4c] sm:$0xf]  ;;  %v1873_v11 = vor.u32 %v2217_v7, %v1872_v4  ;;  %v2250_v4 = vld [vmem:[%s3249_s9 + $0x20] sm:$0xff]  ;;  %v2249_v7 = vld [vmem:[%s3249_s9 + $0x18] sm:$0xff] }
  0xc0   :  { %v1845_v45 = vor.u32 %v2207_v42, %v1842_v43  ;;  %v2233_v42 = vld [vmem:[%s3247_s7 + $0x114] sm:$0xf0]  ;;  %v1808_v43 = vld [vmem:[%s3247_s7 + $0x8] sm:$0xf] }
  0xc1   :  { %v1937_v46 = vor.u32 %v2233_v42, %v1936_v41 }
  0xc2   :  { %1098 = vmatpush.bf16.msrb.mxu3 %v1949_v55 }
  0xc3   :  { %1060 = vmatpush.bf16.msrb.mxu0 %v1801_v48  ;;  %1105 = vmatpush.bf16.msrb.mxu1 %v1921_v31  ;;  %v3027_v48 = vld [vmem:[%s3248_s6] sm:$0x3]  ;;  %v1952_v31 = vld [vmem:[%s3247_s7 + $0x128] sm:$0xf] }
  0xc4   :  { %742 = vmatmul.bf16.vlgmr.msra.gmra.mxu3 %v252_v14  ;;  %v1802_v14 = vld [vmem:[%s3247_s7 + $0x10] sm:$0xf0]  ;;  %v319_v59 = vperm.slane %v3027_v48, 0 }
  0xc5   :  { %v1805_v17 = vor.u32 %v2198_v13, %v1802_v14  ;;  %v2231_v13 = vld [vmem:[%s3247_s7 + $0x10c] sm:$0xf]  ;;  %v1938_v14 = vld [vmem:[%s3247_s7 + $0x118] sm:$0xf0] }
  0xc6   :  { %1099 = vmatpush.bf16.msrb.mxu3 %v1933_v6  ;;  %v2275_v6 = vld [vmem:[%s3249_s9 + $0xe8] sm:$0xff] }
  0xc7   :  { %1131 = vmatpush.bf16.msra.mxu0 %v1925_v54  ;;  %1086 = vmatpush.bf16.msra.mxu2 %v1805_v17  ;;  %v1888_v54 = vld [vmem:[%s3247_s7 + $0xa8] sm:$0xf]  ;;  %v1941_v17 = vor.u32 %v2231_v13, %v1938_v14  ;;  %v2273_v13 = vld [vmem:[%s3249_s9 + $0xd8] sm:$0xff] }
  0xc8   :  { %1106 = vmatpush.bf16.msrb.mxu1 %v1905_v44  ;;  %v1889_v60 = vor.u32 %v2221_v56, %v1888_v54  ;;  %v2201_v44 = vld [vmem:[%s3247_s7 + $0x14] sm:$0xf0]  ;;  %v2247_v14 = vld [vmem:[%s3249_s9 + $0x8] sm:$0xff] }
  0xc9   :  { %v1809_v47 = vor.u32 %v2201_v44, %v1808_v43  ;;  %v2277_v56 = vld [vmem:[%s3249_s9 + $0xf8] sm:$0xff] }
  0xcb   :  { %1132 = vmatpush.bf16.msra.mxu0 %v1909_v63  ;;  %1148 = vmatpush.bf16.msrb.mxu2 %v1989_v35  ;;  %v1954_v63 = vld [vmem:[%s3247_s7 + $0x138] sm:$0xf0]  ;;  %v2205_v35 = vld [vmem:[%s3247_s7 + $0x34] sm:$0xf0] }
  0xcc   :  { %v1957_v0 = vor.u32 %v2235_v62, %v1954_v63  ;;  %1107 = vmatpush.bf16.msrb.mxu1 %v1889_v60  ;;  %v1825_v40 = vor.u32 %v2205_v35, %v1824_v34  ;;  %v2253_v62 = vld [vmem:[%s3249_s9 + $0x38] sm:$0xff]  ;;  %v2252_v63 = vld [vmem:[%s3249_s9 + $0x30] sm:$0xff] }
  0xcf   :  { %1133 = vmatpush.bf16.msra.mxu0 %v1893_v9  ;;  %1149 = vmatpush.bf16.msrb.mxu2 %v1973_v50  ;;  %v1810_v9 = vld [vmem:[%s3247_s7 + $0x18] sm:$0xf0] }
  0xd0   :  { %v1813_v12 = vor.u32 %v2199_v8, %v1810_v9  ;;  %1108 = vmatpush.bf16.msrb.mxu1 %v1873_v11  ;;  %v2258_v8 = vld [vmem:[%s3249_s9 + $0x60] sm:$0xff]  ;;  %v2257_v11 = vld [vmem:[%s3249_s9 + $0x58] sm:$0xff] }
  0xd1   :  { %v2274_v9 = vld [vmem:[%s3249_s9 + $0xe0] sm:$0xff] }
  0xd3   :  { %1134 = vmatpush.bf16.msra.mxu0 %v1877_v19  ;;  %1150 = vmatpush.bf16.msrb.mxu2 %v1957_v0  ;;  %v1984_v19 = vld [vmem:[%s3247_s7 + $0x168] sm:$0xf] }
  0xd4   :  { %v2251_v0 = vld [vmem:[%s3249_s9 + $0x28] sm:$0xff] }
  0xd7   :  { %1135 = vmatpush.bf16.msra.mxu0 %v1861_v32  ;;  %1151 = vmatpush.bf16.msrb.mxu2 %v1941_v17  ;;  %v2237_v32 = vld [vmem:[%s3247_s7 + $0x134] sm:$0xf0]  ;;  %v2268_v17 = vld [vmem:[%s3249_s9 + $0xb0] sm:$0xff] }
  0xdb   :  { %1136 = vmatpush.bf16.msra.mxu0 %v1845_v45  ;;  %v320_v45 = vperm.slane %v3027_v48, 1 }
  0xdf   :  { %1137 = vmatpush.bf16.msra.mxu0 %v1829_v61 }
  0xe3   :  { %1138 = vmatpush.bf16.msra.mxu0 %v1813_v12  ;;  %v2269_v12 = vld [vmem:[%s3249_s9 + $0xb8] sm:$0xff] }
 0x11a   :  { %v2934_v2 = vpop.f32.mrf.mxu1 }
 0x121   :  { %v2966_v15 = vpop.f32.mrf.mxu0 }
 0x122   :  { %v667_v22 = vpop.f32.mrf.mxu1  ;;  %v653_v10 = vadd.f32 %v2966_v15, %v319_v59  ;;  %v2245_v15 = vld [vmem:[%s3247_s7 + $0x174] sm:$0xf0] }
 0x123   :  { %v1985_v21 = vor.u32 %v2245_v15, %v1984_v19  ;;  %v2213_v22 = vld [vmem:[%s3247_s7 + $0x74] sm:$0xf0]  ;;  %v2246_v19 = vld [vmem:[%s3249_s9] sm:$0xff]  ;;  %v2255_v15 = vld [vmem:[%s3249_s9 + $0x48] sm:$0xff] }
 0x124   :  { %v666_v23 = vadd.f32 %v2934_v2, %v653_v10  ;;  %v1857_v24 = vor.u32 %v2213_v22, %v1856_v20  ;;  %v2248_v10 = vld [vmem:[%s3249_s9 + $0x10] sm:$0xff]  ;;  %v2267_v20 = vld [vmem:[%s3249_s9 + $0xa8] sm:$0xff]  ;;  %v2254_v22 = vld [vmem:[%s3249_s9 + $0x40] sm:$0xff] }
 0x125   :  { %1122 = vmatpush.bf16.msra.mxu3 %v1985_v21  ;;  %v2271_v21 = vld [vmem:[%s3249_s9 + $0xc8] sm:$0xff] }
 0x126   :  { %1109 = vmatpush.bf16.msrb.mxu1 %v1857_v24  ;;  %v2270_v24 = vld [vmem:[%s3249_s9 + $0xc0] sm:$0xff] }
 0x127   :  { %v3007_v39 = vpop.f32.mrf.mxu2 }
 0x128   :  { %v679_v2 = vadd.f32 %v3007_v39, %v666_v23  ;;  %v1953_v39 = vor.u32 %v2237_v32, %v1952_v31  ;;  %v2266_v23 = vld [vmem:[%s3249_s9 + $0xa0] sm:$0xff] }
 0x129   :  { %v654_v49 = vpop.f32.mrf.mxu0  ;;  %1123 = vmatpush.bf16.msra.mxu3 %v1969_v28  ;;  %v2263_v28 = vld [vmem:[%s3249_s9 + $0x88] sm:$0xff]  ;;  %v2262_v31 = vld [vmem:[%s3249_s9 + $0x80] sm:$0xff] }
 0x12a   :  { %v3029_v51 = vpop.f32.mrf.mxu1  ;;  %1110 = vmatpush.bf16.msrb.mxu1 %v1841_v30 }
 0x12d   :  { %1124 = vmatpush.bf16.msra.mxu3 %v1953_v39 }
 0x12e   :  { %1111 = vmatpush.bf16.msrb.mxu1 %v1825_v40 }
 0x12f   :  { %v680_v5 = vpop.f32.mrf.mxu2 }
 0x130   :  { %v2259_v5 = vld [vmem:[%s3249_s9 + $0x68] sm:$0xff] }
 0x131   :  { %v704_v16 = vpop.f32.mrf.mxu0  ;;  %1125 = vmatpush.bf16.msra.mxu3 %v1937_v46 }
 0x132   :  { %v719_v18 = vpop.f32.mrf.mxu1  ;;  %v705_v52 = vadd.f32 %v704_v16, %v320_v45  ;;  %1112 = vmatpush.bf16.msrb.mxu1 %v1809_v47  ;;  %v2256_v16 = vld [vmem:[%s3249_s9 + $0x50] sm:$0xff] }
 0x133   :  { %v2272_v18 = vld [vmem:[%s3249_s9 + $0xd0] sm:$0xff] }
 0x134   :  { %v718_v55 = vadd.f32 %v3029_v51, %v705_v52  ;;  %v2261_v51 = vld [vmem:[%s3249_s9 + $0x78] sm:$0xff] }
 0x137   :  { %v691_v33 = vpop.f32.mrf.mxu3 }
 0x138   :  { %v692_v36 = vadd.f32 %v691_v33, %v679_v2  ;;  %v730_v37 = vpop.f32.mrf.mxu2  ;;  %v799_v2 = vld [vmem:[%s3250_s8] sm:$0xf] }
 0x139   :  { %v706_v38 = vpop.f32.mrf.mxu0  ;;  %v731_v48 = vadd.f32 %v730_v37, %v718_v55  ;;  %v801_v32 = vperm.slane %v799_v2, 0  ;;  %v804_v39 = vperm.slane %v799_v2, 3 }
 0x13a   :  { %2278 = vtanh.f32 %v692_v36  ;;  %v802_v36 = vperm.slane %v799_v2, 1 }
 0x13f   :  { %v693_v49 = vpop.f32.mrf.mxu3 }
 0x140   :  { %v2279_v50 = vpop.eup %2278  ;;  %v732_v53 = vpop.f32.mrf.mxu2 }
 0x141   :  { %v749_v54 = vpack.c.bf16 %v2279_v50, %v2279_v50 }
 0x143   :  { %1061 = vmatmul.bf16.vlgmr.msrb.gmra.mxu0 %v749_v54  ;;  %1087 = vmatmul.bf16.vlgmr.msra.gmra.mxu2 %v749_v54 }
 0x144   :  { %1460 = vmatpush.bf16.msrb.mxu0 %v2277_v56  ;;  %1447 = vmatpush.bf16.msra.mxu2 %v2269_v12 }
 0x147   :  { %v743_v57 = vpop.f32.mrf.mxu3 }
 0x148   :  { %v744_v58 = vadd.f32 %v743_v57, %v731_v48  ;;  %1461 = vmatpush.bf16.msrb.mxu0 %v2276_v3  ;;  %1448 = vmatpush.bf16.msra.mxu2 %v2268_v17 }
 0x14a   :  { %2280 = vtanh.f32 %v744_v58  ;;  %v803_v58 = vperm.slane %v799_v2, 2 }
 0x14c   :  { %1462 = vmatpush.bf16.msrb.mxu0 %v2275_v6  ;;  %1449 = vmatpush.bf16.msra.mxu2 %v2267_v20 }
 0x14f   :  { %v745_v59 = vpop.f32.mrf.mxu3 }
 0x150   :  { %v2281_v60 = vpop.eup %2280  ;;  %1463 = vmatpush.bf16.msrb.mxu0 %v2274_v9  ;;  %1450 = vmatpush.bf16.msra.mxu2 %v2266_v23 }
 0x151   :  { %v750_v61 = vpack.c.bf16 %v2281_v60, %v2281_v60 }
 0x153   :  { %1990 = vmatmul.msk.bf16.vlgmr.msra.gmra.mxu1 %vm1049_vm2, %v750_v61  ;;  %1991 = vmatmul.msk.bf16.vlgmr.msrb.gmra.mxu3 %vm1049_vm2, %v750_v61 }
 0x154   :  { %1139 = vmatmul.bf16.vlgmr.msra.gmra.mxu0 %v749_v54  ;;  %1993 = vmatmul.msk.bf16.vlgmr.msrb.gmra.mxu2 %vm1049_vm2, %v750_v61 }
 0x155   :  { %1421 = vmatpush.bf16.msrb.mxu3 %v2253_v62  ;;  %1434 = vmatpush.bf16.msra.mxu1 %v2261_v51 }
 0x156   :  { %1464 = vmatpush.bf16.msrb.mxu0 %v2273_v13  ;;  %1451 = vmatpush.bf16.msra.mxu2 %v2265_v25 }
 0x159   :  { %1422 = vmatpush.bf16.msrb.mxu3 %v2252_v63  ;;  %1435 = vmatpush.bf16.msra.mxu1 %v2260_v1 }
 0x15a   :  { %1465 = vmatpush.bf16.msrb.mxu0 %v2272_v18  ;;  %1452 = vmatpush.bf16.msra.mxu2 %v2264_v27 }
 0x15d   :  { %1423 = vmatpush.bf16.msrb.mxu3 %v2251_v0  ;;  %1436 = vmatpush.bf16.msra.mxu1 %v2259_v5 }
 0x15e   :  { %1466 = vmatpush.bf16.msrb.mxu0 %v2271_v21  ;;  %1453 = vmatpush.bf16.msra.mxu2 %v2263_v28 }
 0x161   :  { %1424 = vmatpush.bf16.msrb.mxu3 %v2250_v4  ;;  %1437 = vmatpush.bf16.msra.mxu1 %v2258_v8 }
 0x162   :  { %1467 = vmatpush.bf16.msrb.mxu0 %v2270_v24  ;;  %1454 = vmatpush.bf16.msra.mxu2 %v2262_v31 }
 0x163   :  { %1113 = vmatmul.bf16.vlgmr.msrb.gmra.mxu1 %v749_v54  ;;  %1992 = vmatmul.msk.bf16.vlgmr.msra.gmra.mxu3 %vm1049_vm2, %v750_v61 }
 0x165   :  { %1425 = vmatpush.bf16.msrb.mxu3 %v2249_v7  ;;  %1438 = vmatpush.bf16.msra.mxu1 %v2257_v11  ;;  %v1473_v11 = vld [vmem:[%s3251_s10] sm:$0xff] }
 0x169   :  { %1426 = vmatpush.bf16.msrb.mxu3 %v2248_v10  ;;  %1439 = vmatpush.bf16.msra.mxu1 %v2256_v16  ;;  %v1478_v16 = vstv %s3252_s11 }
 0x16d   :  { %1427 = vmatpush.bf16.msrb.mxu3 %v2247_v14  ;;  %1440 = vmatpush.bf16.msra.mxu1 %v2255_v15 }
 0x171   :  { %1428 = vmatpush.bf16.msrb.mxu3 %v2246_v19  ;;  %1441 = vmatpush.bf16.msra.mxu1 %v2254_v22 }
 0x1c0   :  { %v1062_v26 = vpop.f32.mrf.mxu0 }
 0x1c1   :  { %v1063_v34 = vadd.f32 %v1062_v26, %v801_v32 }
 0x1c6   :  { %v1088_v29 = vpop.f32.mrf.mxu2 }
 0x1c7   :  { %v1089_v41 = vadd.f32 %v1088_v29, %v802_v36 }
 0x1c8   :  { %v1064_v30 = vpop.f32.mrf.mxu0 }
 0x1ce   :  { %v1090_v33 = vpop.f32.mrf.mxu2 }
 0x1d0   :  { %v1075_v35 = vpop.f32.mrf.mxu1 }
 0x1d1   :  { %v1076_v37 = vadd.f32 %v1075_v35, %v1063_v34  ;;  %v1140_v38 = vpop.f32.mrf.mxu0 }
 0x1d2   :  { %v1141_v43 = vadd.f32 %v1140_v38, %v804_v39 }
 0x1d3   :  { %v1157_v40 = vmax.f32 %v1076_v37, 0.0 }
 0x1d5   :  { %v1161_v42 = vpack.c.bf16 %v1157_v40, %v1157_v40 }
 0x1d6   :  { %v1101_v44 = vpop.f32.mrf.mxu3 }
 0x1d7   :  { %v1102_v45 = vadd.f32 %v1101_v44, %v1089_v41  ;;  %v1153_v46 = vpop.f32.mrf.mxu2  ;;  %1429 = vmatmul.bf16.vlgmr.msrb.gmra.mxu3 %v1161_v42 }
 0x1d8   :  { %v1154_v47 = vadd.f32 %v1153_v46, %v1141_v43  ;;  %v1077_v49 = vpop.f32.mrf.mxu1 }
 0x1d9   :  { %v1158_v50 = vmax.f32 %v1102_v45, 0.0  ;;  %v1142_v52 = vpop.f32.mrf.mxu0 }
 0x1da   :  { %v1160_v53 = vmax.f32 %v1154_v47, 0.0 }
 0x1db   :  { %v1162_v54 = vpack.c.bf16 %v1158_v50, %v1158_v50 }
 0x1dc   :  { %v1164_v55 = vpack.c.bf16 %v1160_v53, %v1160_v53 }
 0x1dd   :  { %1442 = vmatmul.bf16.vlgmr.msra.gmra.mxu1 %v1162_v54 }
 0x1de   :  { %1468 = vmatmul.bf16.vlgmr.msrb.gmra.mxu0 %v1164_v55  ;;  %v1103_v56 = vpop.f32.mrf.mxu3 }
 0x1df   :  { %v1155_v48 = vpop.f32.mrf.mxu2 }
 0x1e0   :  { %v1114_v57 = vpop.f32.mrf.mxu1 }
 0x1e1   :  { %v1115_v59 = vadd.f32 %v1114_v57, %v803_v58 }
 0x1e6   :  { %v1127_v60 = vpop.f32.mrf.mxu3 }
 0x1e7   :  { %v1128_v61 = vadd.f32 %v1127_v60, %v1115_v59 }
 0x1e8   :  { %v1116_v62 = vpop.f32.mrf.mxu1 }
 0x1e9   :  { %v1159_v51 = vmax.f32 %v1128_v61, 0.0 }
 0x1eb   :  { %v1163_v63 = vpack.c.bf16 %v1159_v51, %v1159_v51 }
 0x1ed   :  { %1455 = vmatmul.bf16.vlgmr.msra.gmra.mxu2 %v1163_v63 }
 0x1ee   :  { %v1129_v0 = vpop.f32.mrf.mxu3 }
 0x25a   :  { %v1430_v1 = vpop.f32.mrf.mxu3  ;;  %v1443_v3 = vpop.f32.mrf.mxu1 }
 0x25b   :  { %v1469_v4 = vpop.f32.mrf.mxu0  ;;  %v1444_v8 = vadd.f32 %v1443_v3, %v1430_v1 }
 0x262   :  { %v1432_v5 = vpop.f32.mrf.mxu3  ;;  %v1445_v6 = vpop.f32.mrf.mxu1 }
 0x263   :  { %v1471_v7 = vpop.f32.mrf.mxu0 }
 0x270   :  { %v1456_v9 = vpop.f32.mrf.mxu2 }
 0x271   :  { %v1457_v10 = vadd.f32 %v1456_v9, %v1444_v8 }
 0x273   :  { %v1470_v12 = vadd.f32 %v1469_v4, %v1457_v10 }
 0x275   :  { %v1474_v13 = vmul.f32 %v1473_v11, %v1470_v12 }
 0x277   :  { %1475 = vadd.xlane.f32.xlu0 %v1474_v13 }
 0x278   :  { %v1458_v14 = vpop.f32.mrf.mxu2 }
 0x2ea   :  { %v1476_v17 = vpop.xlane.xlu0 %1475 }
 0x2eb   :  { %v1479_v18 = vadd.f32 %v1478_v16, %v1476_v17 }
 0x2ed   :  { %1481 = vst.msk [vmem:[%s3253_s12] sm:$0xff] %vm1480_vm3, %v1479_v18 }

</bundles_post_ra>
